<compile_context>
chip_gen: v7x
topology: tpu7x:2x2x1
jax: 0.10.0
libtpu: 0.0.40
codegen_flags: <defaults>
</compile_context>

<pallas_src>
import numpy as np
import jax
import jax.numpy as jnp
from jax.experimental import pallas as pl
from jax.experimental.pallas import tpu as pltpu


# ----------------------------- Pallas kernels ------------------------------ #

def _gemm_bias_relu_kernel(x_ref, w_ref, b_ref, o_ref):
    # x_ref: (M, K) im2col patches; w_ref: (K, N) BN-folded weights; b_ref: (1, N)
    acc = jnp.dot(x_ref[...], w_ref[...], preferred_element_type=jnp.float32)
    o_ref[...] = jnp.maximum(acc + b_ref[...], 0.0).astype(o_ref.dtype)


def gemm_bias_relu(x, w, b):
    """ReLU(x @ w + b) as a single-block Pallas call (head shapes are tiny)."""
    M, K = x.shape
    N = w.shape[1]
    return pl.pallas_call(
        _gemm_bias_relu_kernel,
        out_shape=jax.ShapeDtypeStruct((M, N), jnp.float32),
        grid_spec=pltpu.PrefetchScalarGridSpec(
            num_scalar_prefetch=0,
            grid=(1,),
            in_specs=[
                pl.BlockSpec((M, K), lambda i: (0, 0)),
                pl.BlockSpec((K, N), lambda i: (0, 0)),
                pl.BlockSpec((1, N), lambda i: (0, 0)),
            ],
            out_specs=pl.BlockSpec((M, N), lambda i: (0, 0)),
        ),
        compiler_params=pltpu.CompilerParams(
            dimension_semantics=("arbitrary",)),
        cost_estimate=pl.CostEstimate(
            flops=2 * M * K * N,
            transcendentals=0,
            bytes_accessed=4 * (M * K + K * N + N + M * N)),
    )(x, w, b.reshape(1, N))


def _fused_tail_kernel(x_ref, w_ref, b_ref, o_ref):
    # Grid axis = layer index.  The (rows, C) activation lives in the output
    # block, which stays VMEM-resident across the whole ("arbitrary") axis,
    # so intermediate activations never touch HBM.
    l = pl.program_id(0)

    @pl.when(l == 0)
    def _():
        o_ref[...] = x_ref[...]

    y = jnp.dot(o_ref[...], w_ref[0], preferred_element_type=jnp.float32)
    o_ref[...] = jnp.maximum(y + b_ref[0], 0.0).astype(o_ref.dtype)


def fused_center_tap_stack(act, w_stack, b_stack):
    """Apply L consecutive (C->C) matmul+bias+ReLU layers in ONE pallas_call."""
    L, C, _ = w_stack.shape
    R = act.shape[0]
    return pl.pallas_call(
        _fused_tail_kernel,
        out_shape=jax.ShapeDtypeStruct((R, C), jnp.float32),
        grid_spec=pltpu.PrefetchScalarGridSpec(
            num_scalar_prefetch=0,
            grid=(L,),
            in_specs=[
                pl.BlockSpec((R, C), lambda l: (0, 0)),
                pl.BlockSpec((1, C, C), lambda l: (l, 0, 0)),
                pl.BlockSpec((1, 1, C), lambda l: (l, 0, 0)),
            ],
            out_specs=pl.BlockSpec((R, C), lambda l: (0, 0)),
        ),
        compiler_params=pltpu.CompilerParams(
            dimension_semantics=("arbitrary",)),
        cost_estimate=pl.CostEstimate(
            flops=2 * L * R * C * C,
            transcendentals=0,
            bytes_accessed=4 * (R * C + L * C * C + L * C + R * C)),
    )(act, w_stack, b_stack)


# ------------------------------- glue (JAX) -------------------------------- #

def _im2col_3x3(x, stride):
    """x: (N,H,W,C) NHWC.  Zero-pad by 1, gather 3x3 taps -> (N,Ho,Wo,9*C)."""
    N, H, W, C = x.shape
    xp = jnp.pad(x, ((0, 0), (1, 1), (1, 1), (0, 0)))
    Ho = (H + 2 - 3) // stride + 1
    Wo = (W + 2 - 3) // stride + 1
    cols = []
    for kh in range(3):
        for kw in range(3):
            patch = jax.lax.slice(
                xp,
                (0, kh, kw, 0),
                (N, kh + (Ho - 1) * stride + 1, kw + (Wo - 1) * stride + 1, C),
                (1, stride, stride, 1))
            cols.append(patch)
    return jnp.concatenate(cols, axis=-1), Ho, Wo


def conv3x3_bn_relu(x, w_mat, b, stride):
    """x: (N,H,W,Cin) NHWC; w_mat: (9*Cin, Cout); b: (Cout,)."""
    N = x.shape[0]
    patches, Ho, Wo = _im2col_3x3(x, stride)
    Cout = w_mat.shape[1]
    flat = patches.reshape(N * Ho * Wo, patches.shape[-1])
    y = gemm_bias_relu(flat, w_mat, b)
    return y.reshape(N, Ho, Wo, Cout)


def fold_bn(layer, eps=1e-5):
    """Fold eval-mode BatchNorm2d into conv weight/bias (PyTorch semantics)."""
    scale = layer["gamma"] / jnp.sqrt(layer["var"] + eps)
    w = layer["w"] * scale[:, None, None, None]                  # (Cout,Cin,3,3)
    b = (layer["b"] - layer["mean"]) * scale + layer["beta"]     # (Cout,)
    return w, b


def prepare_params(params, in_hw):
    """One-time precompute: fold BN, split head/tail, stack center-tap weights."""
    h, w = in_hw
    split = 0
    for layer in params:                      # layers whose INPUT is >1x1 -> head
        if h == 1 and w == 1:
            break
        s = layer["stride"]
        h = (h - 1) // s + 1
        w = (w - 1) // s + 1
        split += 1

    head = []
    for layer in params[:split]:
        wf, b = fold_bn(layer)
        # (Cout,Cin,3,3) -> (3,3,Cin,Cout) -> (9*Cin, Cout); matches im2col order.
        w_mat = jnp.transpose(wf, (2, 3, 1, 0)).reshape(-1, wf.shape[0])
        head.append((w_mat, b))
    head_strides = tuple(int(l["stride"]) for l in params[:split])

    tw, tb = [], []
    for layer in params[split:]:
        wf, b = fold_bn(layer)
        # 1x1 spatial input + zero padding => only the center tap contributes.
        tw.append(jnp.transpose(wf[:, :, 1, 1], (1, 0)))   # (Cin, Cout)
        tb.append(b.reshape(1, -1))                        # (1, Cout)
    tail_w = jnp.stack(tw, axis=0) if tw else None         # (L, C, C)
    tail_b = jnp.stack(tb, axis=0) if tb else None         # (L, 1, C)

    prepared = {"head": tuple(head), "tail_w": tail_w, "tail_b": tail_b}
    return prepared, head_strides


def map_encoder_forward(prepared, x_nhwc, head_strides):
    x = x_nhwc
    for (w_mat, b), s in zip(prepared["head"], head_strides):
        x = conv3x3_bn_relu(x, w_mat, b, s)
    Nb, Hf, Wf, C = x.shape
    if prepared["tail_w"] is not None:
        act = x.reshape(Nb * Hf * Wf, C)
        act = fused_center_tap_stack(act, prepared["tail_w"], prepared["tail_b"])
        x = act.reshape(Nb, Hf, Wf, C)
    return x


def init_map_encoder_params(key, input_size=4, hidden_size=64):
    """MapEncoder(input_size, hidden_size): 9 stride-2 + 16 stride-1 conv blocks."""
    specs = ([(input_size, hidden_size, 2)]
             + [(hidden_size, hidden_size, 2)] * 8
             + [(hidden_size, hidden_size, 1)] * 16)
    layers = []
    for (cin, cout, stride) in specs:
        key, kw, kb, kg, kbe, km, kv = jax.random.split(key, 7)
        fan_in = cin * 9
        bound = 1.0 / np.sqrt(fan_in)
        layers.append(dict(
            w=jax.random.uniform(kw, (cout, cin, 3, 3), jnp.float32, -bound, bound),
            b=jax.random.uniform(kb, (cout,), jnp.float32, -bound, bound),
            gamma=1.0 + 0.1 * jax.random.normal(kg, (cout,), jnp.float32),
            beta=0.1 * jax.random.normal(kbe, (cout,), jnp.float32),
            mean=0.1 * jax.random.normal(km, (cout,), jnp.float32),
            var=1.0 + 0.1 * jax.random.uniform(kv, (cout,), jnp.float32),
            stride=stride,
        ))
    return layers


def map_encoder_reference(params, x_nhwc, eps=1e-5):
    """Pure-JAX reference (lax.conv) for correctness checking."""
    x = x_nhwc
    for layer in params:
        scale = layer["gamma"] / jnp.sqrt(layer["var"] + eps)
        w = layer["w"] * scale[:, None, None, None]
        b = (layer["b"] - layer["mean"]) * scale + layer["beta"]
        w_hwio = jnp.transpose(w, (2, 3, 1, 0))
        s = layer["stride"]
        y = jax.lax.conv_general_dilated(
            x, w_hwio, window_strides=(s, s), padding=((1, 1), (1, 1)),
            dimension_numbers=("NHWC", "HWIO", "NHWC"),
            precision=jax.lax.Precision.HIGHEST)
        x = jnp.maximum(y + b, 0.0)
    return x


# ---------------------------------- main ----------------------------------- #

if __name__ == "__main__":
    key = jax.random.PRNGKey(0)
    kp, kx = jax.random.split(key)

    # Mantra uses image_dim=4 channels and hidden_size=64 for the map encoder.
    params = init_map_encoder_params(kp, input_size=4, hidden_size=64)

    # Small analogue of data_map (bs, image_dim, H, W) == (2, 4, 16, 16), NCHW.
    x_nchw = jax.random.normal(kx, (2, 4, 16, 16), jnp.float32)
    x_nhwc = jnp.transpose(x_nchw, (0, 2, 3, 1))  # kernel layout: NHWC

    # One-time precompute (BN fold, head/tail split, weight stacking).
    prepared, head_strides = prepare_params(params, in_hw=(16, 16))
    prepared = jax.block_until_ready(prepared)

    fwd = jax.jit(map_encoder_forward, static_argnums=(2,))
    out = jax.block_until_ready(fwd(prepared, x_nhwc, head_strides))
    ref = jax.block_until_ready(map_encoder_reference(params, x_nhwc))

    assert out.shape == ref.shape, (out.shape, ref.shape)
    err = float(jnp.max(jnp.abs(out - ref)))
    scale = float(jnp.max(jnp.abs(ref))) + 1e-6
    if err <= 1e-2 * scale + 1e-3:
        print("KERNEL_OK")
    else:
        raise SystemExit(f"mismatch: max abs err {err} vs ref scale {scale}")
</pallas_src>

<mosaic_0001>
module attributes {stable_mosaic.version = 11 : i64} {
  func.func @_gemm_bias_relu_kernel(%arg0: i32, %arg1: memref<128x36xf32, #tpu.memory_space<vmem>>, %arg2: memref<36x64xf32, #tpu.memory_space<vmem>>, %arg3: memref<1x64xf32, #tpu.memory_space<vmem>>, %arg4: memref<128x64xf32, #tpu.memory_space<vmem>>) attributes {dimension_semantics = [#tpu.dimension_semantics<arbitrary>], iteration_bounds = array<i64: 1>, scalar_prefetch = 0 : i64, scratch_operands = 0 : i64, tpu.core_type = #tpu.core_type<tc>, window_params = [{pipeline_mode = #tpu.pipeline_mode<synchronous>, transform_indices = @transform_0, window_bounds = array<i64: 128, 36>}, {pipeline_mode = #tpu.pipeline_mode<synchronous>, transform_indices = @transform_1, window_bounds = array<i64: 36, 64>}, {pipeline_mode = #tpu.pipeline_mode<synchronous>, transform_indices = @transform_2, window_bounds = array<i64: 1, 64>}, {pipeline_mode = #tpu.pipeline_mode<synchronous>, transform_indices = @transform_3, window_bounds = array<i64: 128, 64>}]} {
    %c0 = arith.constant 0 : index
    %c0_0 = arith.constant 0 : index
    %0 = vector.load %arg1[%c0, %c0_0] : memref<128x36xf32, #tpu.memory_space<vmem>>, vector<128x36xf32>
    %c0_1 = arith.constant 0 : index
    %c0_2 = arith.constant 0 : index
    %1 = vector.load %arg2[%c0_1, %c0_2] : memref<36x64xf32, #tpu.memory_space<vmem>>, vector<36x64xf32>
    %cst = arith.constant dense<0.000000e+00> : vector<128x64xf32>
    %2 = tpu.matmul %0, %1, %cst {dimension_numbers = #tpu.dot_dimension_numbers<[1], [0], [0], [1], [0, 0, 1, 1], [], []>} : vector<128x36xf32>, vector<36x64xf32>, vector<128x64xf32> -> vector<128x64xf32>
    %c0_3 = arith.constant 0 : index
    %c0_4 = arith.constant 0 : index
    %3 = vector.load %arg3[%c0_3, %c0_4] : memref<1x64xf32, #tpu.memory_space<vmem>>, vector<1x64xf32>
    %4 = vector.broadcast %3 : vector<1x64xf32> to vector<128x64xf32>
    %5 = arith.addf %2, %4 : vector<128x64xf32>
    %cst_5 = arith.constant 0.000000e+00 : f32
    %6 = vector.broadcast %cst_5 : f32 to vector<128x64xf32>
    %7 = arith.maximumf %5, %6 : vector<128x64xf32>
    %c0_6 = arith.constant 0 : index
    %c0_7 = arith.constant 0 : index
    %8 = vector.load %arg4[%c0_6, %c0_7] : memref<128x64xf32, #tpu.memory_space<vmem>>, vector<128x64xf32>
    tpu.vector_store %arg4[%c0_6, %c0_7], %7 {strides = array<i32>} : memref<128x64xf32, #tpu.memory_space<vmem>>, vector<128x64xf32>,
    return
  }
  func.func @transform_0(%arg0: i32) -> (i32, i32) {
    %c0_i32 = arith.constant 0 : i32
    %c0_i32_0 = arith.constant 0 : i32
    %c0_i32_1 = arith.constant 0 : i32
    return %c0_i32, %c0_i32_0 : i32, i32
  }
  func.func @transform_1(%arg0: i32) -> (i32, i32) {
    %c0_i32 = arith.constant 0 : i32
    %c0_i32_0 = arith.constant 0 : i32
    %c0_i32_1 = arith.constant 0 : i32
    return %c0_i32, %c0_i32_0 : i32, i32
  }
  func.func @transform_2(%arg0: i32) -> (i32, i32) {
    %c0_i32 = arith.constant 0 : i32
    %c0_i32_0 = arith.constant 0 : i32
    %c0_i32_1 = arith.constant 0 : i32
    return %c0_i32, %c0_i32_0 : i32, i32
  }
  func.func @transform_3(%arg0: i32) -> (i32, i32) {
    %c0_i32 = arith.constant 0 : i32
    %c0_i32_0 = arith.constant 0 : i32
    %c0_i32_1 = arith.constant 0 : i32
    return %c0_i32, %c0_i32_0 : i32, i32
  }
}

module attributes {stable_mosaic.version = 11 : i64} {
  func.func @_gemm_bias_relu_kernel(%arg0: i32, %arg1: memref<32x576xf32, #tpu.memory_space<vmem>>, %arg2: memref<576x64xf32, #tpu.memory_space<vmem>>, %arg3: memref<1x64xf32, #tpu.memory_space<vmem>>, %arg4: memref<32x64xf32, #tpu.memory_space<vmem>>) attributes {dimension_semantics = [#tpu.dimension_semantics<arbitrary>], iteration_bounds = array<i64: 1>, scalar_prefetch = 0 : i64, scratch_operands = 0 : i64, tpu.core_type = #tpu.core_type<tc>, window_params = [{pipeline_mode = #tpu.pipeline_mode<synchronous>, transform_indices = @transform_0, window_bounds = array<i64: 32, 576>}, {pipeline_mode = #tpu.pipeline_mode<synchronous>, transform_indices = @transform_1, window_bounds = array<i64: 576, 64>}, {pipeline_mode = #tpu.pipeline_mode<synchronous>, transform_indices = @transform_2, window_bounds = array<i64: 1, 64>}, {pipeline_mode = #tpu.pipeline_mode<synchronous>, transform_indices = @transform_3, window_bounds = array<i64: 32, 64>}]} {
    %c0 = arith.constant 0 : index
    %c0_0 = arith.constant 0 : index
    %0 = vector.load %arg1[%c0, %c0_0] : memref<32x576xf32, #tpu.memory_space<vmem>>, vector<32x576xf32>
    %c0_1 = arith.constant 0 : index
    %c0_2 = arith.constant 0 : index
    %1 = vector.load %arg2[%c0_1, %c0_2] : memref<576x64xf32, #tpu.memory_space<vmem>>, vector<576x64xf32>
    %cst = arith.constant dense<0.000000e+00> : vector<32x64xf32>
    %2 = tpu.matmul %0, %1, %cst {dimension_numbers = #tpu.dot_dimension_numbers<[1], [0], [0], [1], [0, 0, 1, 1], [], []>} : vector<32x576xf32>, vector<576x64xf32>, vector<32x64xf32> -> vector<32x64xf32>
    %c0_3 = arith.constant 0 : index
    %c0_4 = arith.constant 0 : index
    %3 = vector.load %arg3[%c0_3, %c0_4] : memref<1x64xf32, #tpu.memory_space<vmem>>, vector<1x64xf32>
    %4 = vector.broadcast %3 : vector<1x64xf32> to vector<32x64xf32>
    %5 = arith.addf %2, %4 : vector<32x64xf32>
    %cst_5 = arith.constant 0.000000e+00 : f32
    %6 = vector.broadcast %cst_5 : f32 to vector<32x64xf32>
    %7 = arith.maximumf %5, %6 : vector<32x64xf32>
    %c0_6 = arith.constant 0 : index
    %c0_7 = arith.constant 0 : index
    %8 = vector.load %arg4[%c0_6, %c0_7] : memref<32x64xf32, #tpu.memory_space<vmem>>, vector<32x64xf32>
    tpu.vector_store %arg4[%c0_6, %c0_7], %7 {strides = array<i32>} : memref<32x64xf32, #tpu.memory_space<vmem>>, vector<32x64xf32>,
    return
  }
  func.func @transform_0(%arg0: i32) -> (i32, i32) {
    %c0_i32 = arith.constant 0 : i32
    %c0_i32_0 = arith.constant 0 : i32
    %c0_i32_1 = arith.constant 0 : i32
    return %c0_i32, %c0_i32_0 : i32, i32
  }
  func.func @transform_1(%arg0: i32) -> (i32, i32) {
    %c0_i32 = arith.constant 0 : i32
    %c0_i32_0 = arith.constant 0 : i32
    %c0_i32_1 = arith.constant 0 : i32
    return %c0_i32, %c0_i32_0 : i32, i32
  }
  func.func @transform_2(%arg0: i32) -> (i32, i32) {
    %c0_i32 = arith.constant 0 : i32
    %c0_i32_0 = arith.constant 0 : i32
    %c0_i32_1 = arith.constant 0 : i32
    return %c0_i32, %c0_i32_0 : i32, i32
  }
  func.func @transform_3(%arg0: i32) -> (i32, i32) {
    %c0_i32 = arith.constant 0 : i32
    %c0_i32_0 = arith.constant 0 : i32
    %c0_i32_1 = arith.constant 0 : i32
    return %c0_i32, %c0_i32_0 : i32, i32
  }
}

module attributes {stable_mosaic.version = 11 : i64} {
  func.func @_gemm_bias_relu_kernel(%arg0: i32, %arg1: memref<8x576xf32, #tpu.memory_space<vmem>>, %arg2: memref<576x64xf32, #tpu.memory_space<vmem>>, %arg3: memref<1x64xf32, #tpu.memory_space<vmem>>, %arg4: memref<8x64xf32, #tpu.memory_space<vmem>>) attributes {dimension_semantics = [#tpu.dimension_semantics<arbitrary>], iteration_bounds = array<i64: 1>, scalar_prefetch = 0 : i64, scratch_operands = 0 : i64, tpu.core_type = #tpu.core_type<tc>, window_params = [{pipeline_mode = #tpu.pipeline_mode<synchronous>, transform_indices = @transform_0, window_bounds = array<i64: 8, 576>}, {pipeline_mode = #tpu.pipeline_mode<synchronous>, transform_indices = @transform_1, window_bounds = array<i64: 576, 64>}, {pipeline_mode = #tpu.pipeline_mode<synchronous>, transform_indices = @transform_2, window_bounds = array<i64: 1, 64>}, {pipeline_mode = #tpu.pipeline_mode<synchronous>, transform_indices = @transform_3, window_bounds = array<i64: 8, 64>}]} {
    %c0 = arith.constant 0 : index
    %c0_0 = arith.constant 0 : index
    %0 = vector.load %arg1[%c0, %c0_0] : memref<8x576xf32, #tpu.memory_space<vmem>>, vector<8x576xf32>
    %c0_1 = arith.constant 0 : index
    %c0_2 = arith.constant 0 : index
    %1 = vector.load %arg2[%c0_1, %c0_2] : memref<576x64xf32, #tpu.memory_space<vmem>>, vector<576x64xf32>
    %cst = arith.constant dense<0.000000e+00> : vector<8x64xf32>
    %2 = tpu.matmul %0, %1, %cst {dimension_numbers = #tpu.dot_dimension_numbers<[1], [0], [0], [1], [0, 0, 1, 1], [], []>} : vector<8x576xf32>, vector<576x64xf32>, vector<8x64xf32> -> vector<8x64xf32>
    %c0_3 = arith.constant 0 : index
    %c0_4 = arith.constant 0 : index
    %3 = vector.load %arg3[%c0_3, %c0_4] : memref<1x64xf32, #tpu.memory_space<vmem>>, vector<1x64xf32>
    %4 = vector.broadcast %3 : vector<1x64xf32> to vector<8x64xf32>
    %5 = arith.addf %2, %4 : vector<8x64xf32>
    %cst_5 = arith.constant 0.000000e+00 : f32
    %6 = vector.broadcast %cst_5 : f32 to vector<8x64xf32>
    %7 = arith.maximumf %5, %6 : vector<8x64xf32>
    %c0_6 = arith.constant 0 : index
    %c0_7 = arith.constant 0 : index
    %8 = vector.load %arg4[%c0_6, %c0_7] : memref<8x64xf32, #tpu.memory_space<vmem>>, vector<8x64xf32>
    tpu.vector_store %arg4[%c0_6, %c0_7], %7 {strides = array<i32>} : memref<8x64xf32, #tpu.memory_space<vmem>>, vector<8x64xf32>,
    return
  }
  func.func @transform_0(%arg0: i32) -> (i32, i32) {
    %c0_i32 = arith.constant 0 : i32
    %c0_i32_0 = arith.constant 0 : i32
    %c0_i32_1 = arith.constant 0 : i32
    return %c0_i32, %c0_i32_0 : i32, i32
  }
  func.func @transform_1(%arg0: i32) -> (i32, i32) {
    %c0_i32 = arith.constant 0 : i32
    %c0_i32_0 = arith.constant 0 : i32
    %c0_i32_1 = arith.constant 0 : i32
    return %c0_i32, %c0_i32_0 : i32, i32
  }
  func.func @transform_2(%arg0: i32) -> (i32, i32) {
    %c0_i32 = arith.constant 0 : i32
    %c0_i32_0 = arith.constant 0 : i32
    %c0_i32_1 = arith.constant 0 : i32
    return %c0_i32, %c0_i32_0 : i32, i32
  }
  func.func @transform_3(%arg0: i32) -> (i32, i32) {
    %c0_i32 = arith.constant 0 : i32
    %c0_i32_0 = arith.constant 0 : i32
    %c0_i32_1 = arith.constant 0 : i32
    return %c0_i32, %c0_i32_0 : i32, i32
  }
}

module attributes {stable_mosaic.version = 11 : i64} {
  func.func @_fused_tail_kernel(%arg0: i32, %arg1: memref<2x64xf32, #tpu.memory_space<vmem>>, %arg2: memref<1x64x64xf32, #tpu.memory_space<vmem>>, %arg3: memref<1x1x64xf32, #tpu.memory_space<vmem>>, %arg4: memref<2x64xf32, #tpu.memory_space<vmem>>) attributes {dimension_semantics = [#tpu.dimension_semantics<arbitrary>], iteration_bounds = array<i64: 21>, scalar_prefetch = 0 : i64, scratch_operands = 0 : i64, tpu.core_type = #tpu.core_type<tc>, window_params = [{pipeline_mode = #tpu.pipeline_mode<synchronous>, transform_indices = @transform_0, window_bounds = array<i64: 2, 64>}, {transform_indices = @transform_1, window_bounds = array<i64: 1, 64, 64>}, {transform_indices = @transform_2, window_bounds = array<i64: 1, 1, 64>}, {pipeline_mode = #tpu.pipeline_mode<synchronous>, transform_indices = @transform_3, window_bounds = array<i64: 2, 64>}]} {
    %c0_i32 = arith.constant 0 : i32
    %0 = arith.cmpi eq, %arg0, %c0_i32 : i32
    %1 = arith.extui %0 : i1 to i32
    %c0_i32_0 = arith.constant 0 : i32
    %2 = arith.cmpi ne, %1, %c0_i32_0 : i32
    scf.if %2 {
      %c0_11 = arith.constant 0 : index
      %c0_12 = arith.constant 0 : index
      %14 = vector.load %arg1[%c0_11, %c0_12] : memref<2x64xf32, #tpu.memory_space<vmem>>, vector<2x64xf32>
      %c0_13 = arith.constant 0 : index
      %c0_14 = arith.constant 0 : index
      %15 = vector.load %arg4[%c0_13, %c0_14] : memref<2x64xf32, #tpu.memory_space<vmem>>, vector<2x64xf32>
      tpu.vector_store %arg4[%c0_13, %c0_14], %14 {strides = array<i32>} : memref<2x64xf32, #tpu.memory_space<vmem>>, vector<2x64xf32>,
    } else {
    }
    %c0 = arith.constant 0 : index
    %c0_1 = arith.constant 0 : index
    %3 = vector.load %arg4[%c0, %c0_1] : memref<2x64xf32, #tpu.memory_space<vmem>>, vector<2x64xf32>
    %c0_2 = arith.constant 0 : index
    %c0_3 = arith.constant 0 : index
    %c0_4 = arith.constant 0 : index
    %4 = vector.load %arg2[%c0_2, %c0_3, %c0_4] : memref<1x64x64xf32, #tpu.memory_space<vmem>>, vector<1x64x64xf32>
    %5 = vector.shape_cast %4 : vector<1x64x64xf32> to vector<64x64xf32>
    %cst = arith.constant dense<0.000000e+00> : vector<2x64xf32>
    %6 = tpu.matmul %3, %5, %cst {dimension_numbers = #tpu.dot_dimension_numbers<[1], [0], [0], [1], [0, 0, 1, 1], [], []>} : vector<2x64xf32>, vector<64x64xf32>, vector<2x64xf32> -> vector<2x64xf32>
    %c0_5 = arith.constant 0 : index
    %c0_6 = arith.constant 0 : index
    %c0_7 = arith.constant 0 : index
    %7 = vector.load %arg3[%c0_5, %c0_6, %c0_7] : memref<1x1x64xf32, #tpu.memory_space<vmem>>, vector<1x1x64xf32>
    %8 = vector.shape_cast %7 : vector<1x1x64xf32> to vector<1x64xf32>
    %9 = vector.broadcast %8 : vector<1x64xf32> to vector<2x64xf32>
    %10 = arith.addf %6, %9 : vector<2x64xf32>
    %cst_8 = arith.constant 0.000000e+00 : f32
    %11 = vector.broadcast %cst_8 : f32 to vector<2x64xf32>
    %12 = arith.maximumf %10, %11 : vector<2x64xf32>
    %c0_9 = arith.constant 0 : index
    %c0_10 = arith.constant 0 : index
    %13 = vector.load %arg4[%c0_9, %c0_10] : memref<2x64xf32, #tpu.memory_space<vmem>>, vector<2x64xf32>
    tpu.vector_store %arg4[%c0_9, %c0_10], %12 {strides = array<i32>} : memref<2x64xf32, #tpu.memory_space<vmem>>, vector<2x64xf32>,
    return
  }
  func.func @transform_0(%arg0: i32) -> (i32, i32) {
    %c0_i32 = arith.constant 0 : i32
    %c0_i32_0 = arith.constant 0 : i32
    %c0_i32_1 = arith.constant 0 : i32
    return %c0_i32, %c0_i32_0 : i32, i32
  }
  func.func @transform_1(%arg0: i32) -> (i32, i32, i32) {
    %c0_i32 = arith.constant 0 : i32
    %c0_i32_0 = arith.constant 0 : i32
    %c0_i32_1 = arith.constant 0 : i32
    return %arg0, %c0_i32, %c0_i32_0 : i32, i32, i32
  }
  func.func @transform_2(%arg0: i32) -> (i32, i32, i32) {
    %c0_i32 = arith.constant 0 : i32
    %c0_i32_0 = arith.constant 0 : i32
    %c0_i32_1 = arith.constant 0 : i32
    return %arg0, %c0_i32, %c0_i32_0 : i32, i32, i32
  }
  func.func @transform_3(%arg0: i32) -> (i32, i32) {
    %c0_i32 = arith.constant 0 : i32
    %c0_i32_0 = arith.constant 0 : i32
    %c0_i32_1 = arith.constant 0 : i32
    return %c0_i32, %c0_i32_0 : i32, i32
  }
}

module attributes {stable_mosaic.version = 11 : i64} {
  func.func @_gemm_bias_relu_kernel(%arg0: i32, %arg1: memref<2x576xf32, #tpu.memory_space<vmem>>, %arg2: memref<576x64xf32, #tpu.memory_space<vmem>>, %arg3: memref<1x64xf32, #tpu.memory_space<vmem>>, %arg4: memref<2x64xf32, #tpu.memory_space<vmem>>) attributes {dimension_semantics = [#tpu.dimension_semantics<arbitrary>], iteration_bounds = array<i64: 1>, scalar_prefetch = 0 : i64, scratch_operands = 0 : i64, tpu.core_type = #tpu.core_type<tc>, window_params = [{pipeline_mode = #tpu.pipeline_mode<synchronous>, transform_indices = @transform_0, window_bounds = array<i64: 2, 576>}, {pipeline_mode = #tpu.pipeline_mode<synchronous>, transform_indices = @transform_1, window_bounds = array<i64: 576, 64>}, {pipeline_mode = #tpu.pipeline_mode<synchronous>, transform_indices = @transform_2, window_bounds = array<i64: 1, 64>}, {pipeline_mode = #tpu.pipeline_mode<synchronous>, transform_indices = @transform_3, window_bounds = array<i64: 2, 64>}]} {
    %c0 = arith.constant 0 : index
    %c0_0 = arith.constant 0 : index
    %0 = vector.load %arg1[%c0, %c0_0] : memref<2x576xf32, #tpu.memory_space<vmem>>, vector<2x576xf32>
    %c0_1 = arith.constant 0 : index
    %c0_2 = arith.constant 0 : index
    %1 = vector.load %arg2[%c0_1, %c0_2] : memref<576x64xf32, #tpu.memory_space<vmem>>, vector<576x64xf32>
    %cst = arith.constant dense<0.000000e+00> : vector<2x64xf32>
    %2 = tpu.matmul %0, %1, %cst {dimension_numbers = #tpu.dot_dimension_numbers<[1], [0], [0], [1], [0, 0, 1, 1], [], []>} : vector<2x576xf32>, vector<576x64xf32>, vector<2x64xf32> -> vector<2x64xf32>
    %c0_3 = arith.constant 0 : index
    %c0_4 = arith.constant 0 : index
    %3 = vector.load %arg3[%c0_3, %c0_4] : memref<1x64xf32, #tpu.memory_space<vmem>>, vector<1x64xf32>
    %4 = vector.broadcast %3 : vector<1x64xf32> to vector<2x64xf32>
    %5 = arith.addf %2, %4 : vector<2x64xf32>
    %cst_5 = arith.constant 0.000000e+00 : f32
    %6 = vector.broadcast %cst_5 : f32 to vector<2x64xf32>
    %7 = arith.maximumf %5, %6 : vector<2x64xf32>
    %c0_6 = arith.constant 0 : index
    %c0_7 = arith.constant 0 : index
    %8 = vector.load %arg4[%c0_6, %c0_7] : memref<2x64xf32, #tpu.memory_space<vmem>>, vector<2x64xf32>
    tpu.vector_store %arg4[%c0_6, %c0_7], %7 {strides = array<i32>} : memref<2x64xf32, #tpu.memory_space<vmem>>, vector<2x64xf32>,
    return
  }
  func.func @transform_0(%arg0: i32) -> (i32, i32) {
    %c0_i32 = arith.constant 0 : i32
    %c0_i32_0 = arith.constant 0 : i32
    %c0_i32_1 = arith.constant 0 : i32
    return %c0_i32, %c0_i32_0 : i32, i32
  }
  func.func @transform_1(%arg0: i32) -> (i32, i32) {
    %c0_i32 = arith.constant 0 : i32
    %c0_i32_0 = arith.constant 0 : i32
    %c0_i32_1 = arith.constant 0 : i32
    return %c0_i32, %c0_i32_0 : i32, i32
  }
  func.func @transform_2(%arg0: i32) -> (i32, i32) {
    %c0_i32 = arith.constant 0 : i32
    %c0_i32_0 = arith.constant 0 : i32
    %c0_i32_1 = arith.constant 0 : i32
    return %c0_i32, %c0_i32_0 : i32, i32
  }
  func.func @transform_3(%arg0: i32) -> (i32, i32) {
    %c0_i32 = arith.constant 0 : i32
    %c0_i32_0 = arith.constant 0 : i32
    %c0_i32_1 = arith.constant 0 : i32
    return %c0_i32, %c0_i32_0 : i32, i32
  }
}

</mosaic_0001>

<bundles_post_ra>
// kernel: map_encoder_forward.5
= control target key start
LH: loop header
LB: loop body
LE: loop exit
PB: predicated region body
PF: predicated region fallthrough
CT: control target
= control target key end

     0   :  { %vm42_vm0 = vcmask 293888   ;;  %vm91_vm1 = vcmask 1043456   ;;  %vm256_vm2 = vcmask 523264   ;;  %s530_s1 = inlined_call_operand.vmem [shape: f32[36,64], index: 1, kind: input, shape index: {}]   ;;  %s531_s0 = inlined_call_operand.vmem [shape: f32[128,36], index: 0, kind: input, shape index: {}]   ;;  %s532_s2 = inlined_call_operand.vmem [shape: f32[1,64], index: 2, kind: input, shape index: {}]   ;;  %s533_s3 = inlined_call_operand.vmem [shape: f32[128,64], index: 3, kind: output, shape index: {}]  }
   0x1   :  { %v30_v0 = vld [vmem:[%s530_s1] sm:$0xff]  ;;  %v31_v1 = vld [vmem:[%s530_s1 + $0x8] sm:$0xff]  ;;  %v32_v2 = vld [vmem:[%s530_s1 + $0x10] sm:$0xff] }
   0x2   :  { %v350_v3 = vpack.c.bf16 %v31_v1, %v30_v0  ;;  %v33_v4 = vld [vmem:[%s530_s1 + $0x18] sm:$0xff]  ;;  %v14_v5 = vld [vmem:[%s531_s0] sm:$0xff]  ;;  %v15_v9 = vld [vmem:[%s531_s0 + $0x8] sm:$0xff] }
   0x3   :  { %v354_v6 = vpack.c.bf16 %v33_v4, %v32_v2  ;;  %326 = vmatprep.mubr.msk.f32.mxu0 %vm42_vm0, %v14_v5  ;;  %v22_v7 = vld [vmem:[%s531_s0 + $0x40] sm:$0xff]  ;;  %v23_v10 = vld [vmem:[%s531_s0 + $0x48] sm:$0xff]  ;;  %v16_v11 = vld [vmem:[%s531_s0 + $0x10] sm:$0xff] }
   0x4   :  { %351 = vmatprep.subr.bf16.mxu0 %v350_v3  ;;  %358 = vmatprep.subr.bf16.mxu1 %v350_v3  ;;  %v34_v8 = vld [vmem:[%s530_s1 + $0x20] sm:$0xf]  ;;  %v24_v12 = vld [vmem:[%s531_s0 + $0x50] sm:$0xff]  ;;  %v17_v13 = vld [vmem:[%s531_s0 + $0x18] sm:$0xff] }
   0x5   :  { %353 = vmatpush3.bf16.msra.mxu0 %v350_v3  ;;  %361 = vmatpush3.bf16.msra.mxu1 %v350_v3  ;;  %v25_v14 = vld [vmem:[%s531_s0 + $0x58] sm:$0xff]  ;;  %v18_v15 = vld [vmem:[%s531_s0 + $0x20] sm:$0xff]  ;;  %v19_v17 = vld [vmem:[%s531_s0 + $0x28] sm:$0xff] }
   0x6   :  { %355 = vmatprep.subr.bf16.mxu0 %v354_v6  ;;  %359 = vmatprep.subr.bf16.mxu1 %v354_v6  ;;  %v26_v16 = vld [vmem:[%s531_s0 + $0x60] sm:$0xff]  ;;  %v27_v18 = vld [vmem:[%s531_s0 + $0x68] sm:$0xff]  ;;  %v20_v19 = vld [vmem:[%s531_s0 + $0x30] sm:$0xff] }
   0x7   :  { %338 = vmatprep.mubr.msk.f32.mxu1 %vm42_vm0, %v22_v7  ;;  %v28_v20 = vld [vmem:[%s531_s0 + $0x70] sm:$0xff]  ;;  %v21_v21 = vld [vmem:[%s531_s0 + $0x38] sm:$0xff]  ;;  %v277_v23 = vld [vmem:[%s532_s2] ss:$0 sm:$0xff] }
   0x8   :  { %v29_v22 = vld [vmem:[%s531_s0 + $0x78] sm:$0xff] }
   0x9   :  { %357 = vmatpush3.bf16.msra.mxu0 %v354_v6  ;;  %362 = vmatpush3.bf16.msra.mxu1 %v354_v6 }
   0xa   :  { %324 = vmatprep.subr.msk.mxu0 %vm91_vm1, %v34_v8  ;;  %360 = vmatprep.subr.msk.mxu1 %vm91_vm1, %v34_v8 }
   0xd   :  { %325 = vmatpush3.msk.msra.mxu0 %vm91_vm1, %v34_v8  ;;  %363 = vmatpush3.msk.msra.mxu1 %vm91_vm1, %v34_v8 }
   0xe   :  { %327 = vmatmul.mubr.msk.f32.vlgmr.msra.gmra.mrb[0].mxu0 %vm42_vm0, %v15_v9  ;;  %339 = vmatmul.mubr.msk.f32.vlgmr.msra.gmra.mrb[0].mxu1 %vm42_vm0, %v23_v10 }
   0xf   :  { %329 = vmatprep.mubr.msk.f32.mxu0 %vm42_vm0, %v16_v11  ;;  %341 = vmatprep.mubr.msk.f32.mxu1 %vm42_vm0, %v24_v12 }
  0x12   :  { %330 = vmatmul.mubr.msk.f32.gmra.mrb[2].mxu0 %vm42_vm0, %v17_v13  ;;  %342 = vmatmul.mubr.msk.f32.gmra.mrb[2].mxu1 %vm42_vm0, %v25_v14 }
  0x13   :  { %332 = vmatprep.mubr.msk.f32.mxu0 %vm42_vm0, %v18_v15  ;;  %344 = vmatprep.mubr.msk.f32.mxu1 %vm42_vm0, %v26_v16 }
  0x16   :  { %333 = vmatmul.mubr.msk.f32.gmra.mrb[4].mxu0 %vm42_vm0, %v19_v17  ;;  %345 = vmatmul.mubr.msk.f32.gmra.mrb[4].mxu1 %vm42_vm0, %v27_v18 }
  0x17   :  { %335 = vmatprep.mubr.msk.f32.mxu0 %vm42_vm0, %v20_v19  ;;  %347 = vmatprep.mubr.msk.f32.mxu1 %vm42_vm0, %v28_v20 }
  0x1a   :  { %336 = vmatmul.mubr.msk.f32.gmra.mrb[6].mxu0 %vm42_vm0, %v21_v21  ;;  %348 = vmatmul.mubr.msk.f32.gmra.mrb[6].mxu1 %vm42_vm0, %v29_v22 }
  0xe1   :  { %v328_v24 = vpop.f32.mrb[0].mxu0  ;;  %v340_v25 = vpop.f32.mrb[0].mxu1 }
  0xe2   :  { %v167_v26 = vadd.f32 %v328_v24, %v277_v23  ;;  %v207_v27 = vadd.f32 %v340_v25, %v277_v23  ;;  %v161_v28 = vpop.f32.mrb[1].mxu0  ;;  %v201_v29 = vpop.f32.mrb[1].mxu1 }
  0xe3   :  { %v162_v30 = vadd.f32 %v277_v23, %v161_v28  ;;  %v202_v31 = vadd.f32 %v277_v23, %v201_v29 }
  0xe4   :  { %v241_v32 = vmax.f32 %v167_v26, 0.0  ;;  %v249_v33 = vmax.f32 %v207_v27, 0.0 }
  0xe5   :  { %v240_v34 = vmax.f32 %v162_v30, 0.0  ;;  %v248_v35 = vmax.f32 %v202_v31, 0.0  ;;  %v331_v36 = vpop.f32.mrb[2].mxu0  ;;  %v343_v37 = vpop.f32.mrb[2].mxu1 }
  0xe6   :  { %258 = vst.msk [vmem:[%s533_s3 + $0x8] sm:$0xff] %vm256_vm2, %v241_v32  ;;  %266 = vst.msk [vmem:[%s533_s3 + $0x48] sm:$0xff] %vm256_vm2, %v249_v33  ;;  %v177_v38 = vadd.f32 %v331_v36, %v277_v23  ;;  %v217_v39 = vadd.f32 %v343_v37, %v277_v23  ;;  %v171_v40 = vpop.f32.mrb[3].mxu0  ;;  %v211_v41 = vpop.f32.mrb[3].mxu1 }
  0xe7   :  { %257 = vst.msk [vmem:[%s533_s3] sm:$0xff] %vm256_vm2, %v240_v34  ;;  %265 = vst.msk [vmem:[%s533_s3 + $0x40] sm:$0xff] %vm256_vm2, %v248_v35  ;;  %v172_v42 = vadd.f32 %v277_v23, %v171_v40  ;;  %v212_v43 = vadd.f32 %v277_v23, %v211_v41 }
  0xe8   :  { %v243_v44 = vmax.f32 %v177_v38, 0.0  ;;  %v251_v45 = vmax.f32 %v217_v39, 0.0 }
  0xe9   :  { %v242_v46 = vmax.f32 %v172_v42, 0.0  ;;  %v250_v47 = vmax.f32 %v212_v43, 0.0  ;;  %v334_v48 = vpop.f32.mrb[4].mxu0  ;;  %v346_v49 = vpop.f32.mrb[4].mxu1 }
  0xea   :  { %260 = vst.msk [vmem:[%s533_s3 + $0x18] sm:$0xff] %vm256_vm2, %v243_v44  ;;  %268 = vst.msk [vmem:[%s533_s3 + $0x58] sm:$0xff] %vm256_vm2, %v251_v45  ;;  %v187_v50 = vadd.f32 %v334_v48, %v277_v23  ;;  %v227_v51 = vadd.f32 %v346_v49, %v277_v23  ;;  %v181_v52 = vpop.f32.mrb[5].mxu0  ;;  %v221_v53 = vpop.f32.mrb[5].mxu1 }
  0xeb   :  { %259 = vst.msk [vmem:[%s533_s3 + $0x10] sm:$0xff] %vm256_vm2, %v242_v46  ;;  %267 = vst.msk [vmem:[%s533_s3 + $0x50] sm:$0xff] %vm256_vm2, %v250_v47  ;;  %v182_v54 = vadd.f32 %v277_v23, %v181_v52  ;;  %v222_v55 = vadd.f32 %v277_v23, %v221_v53 }
  0xec   :  { %v245_v56 = vmax.f32 %v187_v50, 0.0  ;;  %v253_v57 = vmax.f32 %v227_v51, 0.0 }
  0xed   :  { %v244_v58 = vmax.f32 %v182_v54, 0.0  ;;  %v252_v59 = vmax.f32 %v222_v55, 0.0  ;;  %v337_v60 = vpop.f32.mrb[6].mxu0  ;;  %v349_v61 = vpop.f32.mrb[6].mxu1 }
  0xee   :  { %262 = vst.msk [vmem:[%s533_s3 + $0x28] sm:$0xff] %vm256_vm2, %v245_v56  ;;  %270 = vst.msk [vmem:[%s533_s3 + $0x68] sm:$0xff] %vm256_vm2, %v253_v57  ;;  %v197_v62 = vadd.f32 %v337_v60, %v277_v23  ;;  %v237_v63 = vadd.f32 %v349_v61, %v277_v23  ;;  %v191_v0 = vpop.f32.mrb[7].mxu0  ;;  %v231_v1 = vpop.f32.mrb[7].mxu1 }
  0xef   :  { %261 = vst.msk [vmem:[%s533_s3 + $0x20] sm:$0xff] %vm256_vm2, %v244_v58  ;;  %269 = vst.msk [vmem:[%s533_s3 + $0x60] sm:$0xff] %vm256_vm2, %v252_v59  ;;  %v192_v2 = vadd.f32 %v277_v23, %v191_v0  ;;  %v232_v3 = vadd.f32 %v277_v23, %v231_v1 }
  0xf0   :  { %v247_v4 = vmax.f32 %v197_v62, 0.0  ;;  %v255_v5 = vmax.f32 %v237_v63, 0.0 }
  0xf1   :  { %v246_v6 = vmax.f32 %v192_v2, 0.0  ;;  %v254_v7 = vmax.f32 %v232_v3, 0.0 }
  0xf2   :  { %264 = vst.msk [vmem:[%s533_s3 + $0x38] sm:$0xff] %vm256_vm2, %v247_v4  ;;  %272 = vst.msk [vmem:[%s533_s3 + $0x78] sm:$0xff] %vm256_vm2, %v255_v5 }
  0xf3   :  { %263 = vst.msk [vmem:[%s533_s3 + $0x30] sm:$0xff] %vm256_vm2, %v246_v6  ;;  %271 = vst.msk [vmem:[%s533_s3 + $0x70] sm:$0xff] %vm256_vm2, %v254_v7 }

// kernel: map_encoder_forward.6
= control target key start
LH: loop header
LB: loop body
LE: loop exit
PB: predicated region body
PF: predicated region fallthrough
CT: control target
= control target key end

     0   :  { %vm113_vm0 = vcmask 523264   ;;  %s927_s1 = inlined_call_operand.vmem [shape: f32[576,64], index: 1, kind: input, shape index: {}]   ;;  %s928_s0 = inlined_call_operand.vmem [shape: f32[32,576], index: 0, kind: input, shape index: {}]   ;;  %s929_s2 = inlined_call_operand.vmem [shape: f32[1,64], index: 2, kind: input, shape index: {}]   ;;  %s930_s3 = inlined_call_operand.vmem [shape: f32[32,64], index: 3, kind: output, shape index: {}]  }
   0x1   :  { %v50_v0 = vld [vmem:[%s927_s1 + $0x80] sm:$0xff]  ;;  %v51_v1 = vld [vmem:[%s927_s1 + $0x88] sm:$0xff]  ;;  %v52_v11 = vld [vmem:[%s927_s1 + $0x90] sm:$0xff] }
   0x2   :  { %v82_v2 = vld [vmem:[%s927_s1 + $0x180] sm:$0xff]  ;;  %v520_v3 = vpack.c.bf16 %v51_v1, %v50_v0  ;;  %v83_v4 = vld [vmem:[%s927_s1 + $0x188] sm:$0xff]  ;;  %v53_v13 = vld [vmem:[%s927_s1 + $0x98] sm:$0xff] }
   0x3   :  { %v34_v5 = vld [vmem:[%s927_s1] sm:$0xff]  ;;  %v35_v6 = vld [vmem:[%s927_s1 + $0x8] sm:$0xff]  ;;  %v552_v7 = vpack.c.bf16 %v83_v4, %v82_v2  ;;  %v84_v14 = vld [vmem:[%s927_s1 + $0x190] sm:$0xff]  ;;  %v524_v16 = vpack.c.bf16 %v53_v13, %v52_v11 }
   0x4   :  { %v522_v8 = vpack.c.bf16 %v35_v6, %v34_v5  ;;  %v66_v9 = vld [vmem:[%s927_s1 + $0x100] sm:$0xff]  ;;  %v67_v10 = vld [vmem:[%s927_s1 + $0x108] sm:$0xff]  ;;  %521 = vmatprep.subr.bf16.mxu0 %v520_v3  ;;  %v85_v15 = vld [vmem:[%s927_s1 + $0x198] sm:$0xff] }
   0x5   :  { %v554_v12 = vpack.c.bf16 %v67_v10, %v66_v9  ;;  %553 = vmatprep.subr.bf16.mxu1 %v552_v7  ;;  %v556_v17 = vpack.c.bf16 %v85_v15, %v84_v14  ;;  %v36_v18 = vld [vmem:[%s927_s1 + $0x10] sm:$0xff]  ;;  %v37_v19 = vld [vmem:[%s927_s1 + $0x18] sm:$0xff]  ;;  %v54_v23 = vld [vmem:[%s927_s1 + $0xa0] sm:$0xff] }
   0x6   :  { %523 = vmatpush3.bf16.msra.mxu0 %v522_v8  ;;  %v68_v20 = vld [vmem:[%s927_s1 + $0x110] sm:$0xff]  ;;  %v526_v21 = vpack.c.bf16 %v37_v19, %v36_v18  ;;  %v69_v22 = vld [vmem:[%s927_s1 + $0x118] sm:$0xff]  ;;  %v55_v24 = vld [vmem:[%s927_s1 + $0xa8] sm:$0xff] }
   0x7   :  { %555 = vmatpush3.bf16.msra.mxu1 %v554_v12  ;;  %525 = vmatprep.subr.bf16.mxu0 %v524_v16  ;;  %v558_v25 = vpack.c.bf16 %v69_v22, %v68_v20  ;;  %v528_v26 = vpack.c.bf16 %v55_v24, %v54_v23  ;;  %v86_v27 = vld [vmem:[%s927_s1 + $0x1a0] sm:$0xff]  ;;  %v87_v28 = vld [vmem:[%s927_s1 + $0x1a8] sm:$0xff]  ;;  %v56_v35 = vld [vmem:[%s927_s1 + $0xb0] sm:$0xff] }
   0x8   :  { %557 = vmatprep.subr.bf16.mxu1 %v556_v17  ;;  %v38_v29 = vld [vmem:[%s927_s1 + $0x20] sm:$0xff]  ;;  %v560_v30 = vpack.c.bf16 %v87_v28, %v86_v27  ;;  %v39_v31 = vld [vmem:[%s927_s1 + $0x28] sm:$0xff]  ;;  %v57_v36 = vld [vmem:[%s927_s1 + $0xb8] sm:$0xff] }
   0x9   :  { %v70_v32 = vld [vmem:[%s927_s1 + $0x120] sm:$0xff]  ;;  %v71_v33 = vld [vmem:[%s927_s1 + $0x128] sm:$0xff]  ;;  %v530_v34 = vpack.c.bf16 %v39_v31, %v38_v29  ;;  %v88_v37 = vld [vmem:[%s927_s1 + $0x1b0] sm:$0xff]  ;;  %v532_v39 = vpack.c.bf16 %v57_v36, %v56_v35 }
   0xa   :  { %527 = vmatpush3.bf16.msra.mxu0 %v526_v21  ;;  %v562_v38 = vpack.c.bf16 %v71_v33, %v70_v32  ;;  %v89_v40 = vld [vmem:[%s927_s1 + $0x1b8] sm:$0xff]  ;;  %v40_v41 = vld [vmem:[%s927_s1 + $0x30] sm:$0xff]  ;;  %v58_v46 = vld [vmem:[%s927_s1 + $0xc0] sm:$0xff] }
   0xb   :  { %559 = vmatpush3.bf16.msra.mxu1 %v558_v25  ;;  %529 = vmatprep.subr.bf16.mxu0 %v528_v26  ;;  %v41_v42 = vld [vmem:[%s927_s1 + $0x38] sm:$0xff]  ;;  %v564_v43 = vpack.c.bf16 %v89_v40, %v88_v37  ;;  %v72_v44 = vld [vmem:[%s927_s1 + $0x130] sm:$0xff]  ;;  %v59_v47 = vld [vmem:[%s927_s1 + $0xc8] sm:$0xff] }
   0xc   :  { %561 = vmatprep.subr.bf16.mxu1 %v560_v30  ;;  %v73_v45 = vld [vmem:[%s927_s1 + $0x138] sm:$0xff]  ;;  %v90_v48 = vld [vmem:[%s927_s1 + $0x1c0] sm:$0xff]  ;;  %v91_v49 = vld [vmem:[%s927_s1 + $0x1c8] sm:$0xff]  ;;  %v534_v50 = vpack.c.bf16 %v41_v42, %v40_v41  ;;  %v536_v52 = vpack.c.bf16 %v59_v47, %v58_v46 }
   0xd   :  { %v566_v51 = vpack.c.bf16 %v73_v45, %v72_v44  ;;  %v42_v53 = vld [vmem:[%s927_s1 + $0x40] sm:$0xff]  ;;  %v43_v54 = vld [vmem:[%s927_s1 + $0x48] sm:$0xff]  ;;  %v568_v56 = vpack.c.bf16 %v91_v49, %v90_v48  ;;  %v60_v58 = vld [vmem:[%s927_s1 + $0xd0] sm:$0xff] }
   0xe   :  { %531 = vmatpush3.bf16.msra.mxu0 %v530_v34  ;;  %v74_v55 = vld [vmem:[%s927_s1 + $0x140] sm:$0xff]  ;;  %v75_v57 = vld [vmem:[%s927_s1 + $0x148] sm:$0xff]  ;;  %v61_v59 = vld [vmem:[%s927_s1 + $0xd8] sm:$0xff]  ;;  %v538_v62 = vpack.c.bf16 %v43_v54, %v42_v53 }
   0xf   :  { %563 = vmatpush3.bf16.msra.mxu1 %v562_v38  ;;  %533 = vmatprep.subr.bf16.mxu0 %v532_v39  ;;  %v92_v60 = vld [vmem:[%s927_s1 + $0x1d0] sm:$0xff]  ;;  %v93_v61 = vld [vmem:[%s927_s1 + $0x1d8] sm:$0xff]  ;;  %v570_v63 = vpack.c.bf16 %v75_v57, %v74_v55  ;;  %v540_v0 = vpack.c.bf16 %v61_v59, %v60_v58  ;;  %v62_v6 = vld [vmem:[%s927_s1 + $0xe0] sm:$0xff] }
  0x10   :  { %565 = vmatprep.subr.bf16.mxu1 %v564_v43  ;;  %v44_v1 = vld [vmem:[%s927_s1 + $0x50] sm:$0xff]  ;;  %v45_v2 = vld [vmem:[%s927_s1 + $0x58] sm:$0xff]  ;;  %v572_v4 = vpack.c.bf16 %v93_v61, %v92_v60  ;;  %v63_v7 = vld [vmem:[%s927_s1 + $0xe8] sm:$0xff] }
  0x11   :  { %v76_v3 = vld [vmem:[%s927_s1 + $0x150] sm:$0xff]  ;;  %v77_v5 = vld [vmem:[%s927_s1 + $0x158] sm:$0xff]  ;;  %v94_v8 = vld [vmem:[%s927_s1 + $0x1e0] sm:$0xff]  ;;  %v542_v10 = vpack.c.bf16 %v45_v2, %v44_v1  ;;  %v544_v14 = vpack.c.bf16 %v63_v7, %v62_v6 }
  0x12   :  { %535 = vmatpush3.bf16.msra.mxu0 %v534_v50  ;;  %v95_v9 = vld [vmem:[%s927_s1 + $0x1e8] sm:$0xff]  ;;  %v46_v11 = vld [vmem:[%s927_s1 + $0x60] sm:$0xff]  ;;  %v574_v13 = vpack.c.bf16 %v77_v5, %v76_v3  ;;  %v17_v17 = vld [vmem:[%s928_s0 + $0x18] sm:$0xff] }
  0x13   :  { %567 = vmatpush3.bf16.msra.mxu1 %v566_v51  ;;  %537 = vmatprep.subr.bf16.mxu0 %v536_v52  ;;  %v47_v12 = vld [vmem:[%s927_s1 + $0x68] sm:$0xff]  ;;  %v78_v15 = vld [vmem:[%s927_s1 + $0x160] sm:$0xff]  ;;  %v576_v18 = vpack.c.bf16 %v95_v9, %v94_v8  ;;  %v64_v20 = vld [vmem:[%s927_s1 + $0xf0] sm:$0xff] }
  0x14   :  { %569 = vmatprep.subr.bf16.mxu1 %v568_v56  ;;  %v15_v16 = vld [vmem:[%s928_s0 + $0x8] sm:$0xff]  ;;  %v65_v21 = vld [vmem:[%s927_s1 + $0xf8] sm:$0xff]  ;;  %v96_v22 = vld [vmem:[%s927_s1 + $0x1f0] sm:$0xff]  ;;  %275 = vmatprep.mubr.f32.mxu1 %v17_v17  ;;  %v546_v24 = vpack.c.bf16 %v47_v12, %v46_v11 }
  0x15   :  { %v79_v19 = vld [vmem:[%s927_s1 + $0x168] sm:$0xff]  ;;  %190 = vmatprep.mubr.f32.mxu0 %v15_v16  ;;  %v97_v23 = vld [vmem:[%s927_s1 + $0x1f8] sm:$0xff]  ;;  %v548_v26 = vpack.c.bf16 %v65_v21, %v64_v20  ;;  %v48_v27 = vld [vmem:[%s927_s1 + $0x70] sm:$0xff] }
  0x16   :  { %539 = vmatpush3.bf16.msra.mxu0 %v538_v62  ;;  %v578_v25 = vpack.c.bf16 %v79_v19, %v78_v15  ;;  %v49_v28 = vld [vmem:[%s927_s1 + $0x78] sm:$0xff]  ;;  %v80_v29 = vld [vmem:[%s927_s1 + $0x170] sm:$0xff]  ;;  %v580_v30 = vpack.c.bf16 %v97_v23, %v96_v22  ;;  %v98_v32 = vld [vmem:[%s927_s1 + $0x200] sm:$0xff] }
  0x17   :  { %571 = vmatpush3.bf16.msra.mxu1 %v570_v63  ;;  %541 = vmatprep.subr.bf16.mxu0 %v540_v0  ;;  %v81_v31 = vld [vmem:[%s927_s1 + $0x178] sm:$0xff]  ;;  %v99_v33 = vld [vmem:[%s927_s1 + $0x208] sm:$0xff]  ;;  %v550_v34 = vpack.c.bf16 %v49_v28, %v48_v27  ;;  %v100_v37 = vld [vmem:[%s927_s1 + $0x210] sm:$0xff] }
  0x18   :  { %573 = vmatprep.subr.bf16.mxu1 %v572_v4  ;;  %v582_v35 = vpack.c.bf16 %v81_v31, %v80_v29  ;;  %v584_v36 = vpack.c.bf16 %v99_v33, %v98_v32  ;;  %v101_v38 = vld [vmem:[%s927_s1 + $0x218] sm:$0xff]  ;;  %v14_v39 = vld [vmem:[%s928_s0] sm:$0xff]  ;;  %v16_v40 = vld [vmem:[%s928_s0 + $0x10] sm:$0xff] }
  0x19   :  { %v20_v41 = vld [vmem:[%s928_s0 + $0x30] sm:$0xff]  ;;  %v588_v42 = vpack.c.bf16 %v101_v38, %v100_v37  ;;  %v22_v43 = vld [vmem:[%s928_s0 + $0x40] sm:$0xff]  ;;  %v103_v45 = vld [vmem:[%s927_s1 + $0x228] sm:$0xff] }
  0x1a   :  { %543 = vmatpush3.bf16.msra.mxu0 %v542_v10  ;;  %v102_v44 = vld [vmem:[%s927_s1 + $0x220] sm:$0xff]  ;;  %v19_v46 = vld [vmem:[%s928_s0 + $0x28] sm:$0xff]  ;;  %v21_v47 = vld [vmem:[%s928_s0 + $0x38] sm:$0xff] }
  0x1b   :  { %575 = vmatpush3.bf16.msra.mxu1 %v574_v13  ;;  %545 = vmatprep.subr.bf16.mxu0 %v544_v14  ;;  %v25_v48 = vld [vmem:[%s928_s0 + $0x58] sm:$0xff]  ;;  %v592_v49 = vpack.c.bf16 %v103_v45, %v102_v44  ;;  %v27_v50 = vld [vmem:[%s928_s0 + $0x68] sm:$0xff]  ;;  %v104_v51 = vld [vmem:[%s927_s1 + $0x230] sm:$0xff] }
  0x1c   :  { %577 = vmatprep.subr.bf16.mxu1 %v576_v18  ;;  %v105_v52 = vld [vmem:[%s927_s1 + $0x238] sm:$0xff]  ;;  %v24_v53 = vld [vmem:[%s928_s0 + $0x50] sm:$0xff]  ;;  %v26_v54 = vld [vmem:[%s928_s0 + $0x60] sm:$0xff] }
  0x1d   :  { %v30_v55 = vld [vmem:[%s928_s0 + $0x80] sm:$0xff]  ;;  %v596_v56 = vpack.c.bf16 %v105_v52, %v104_v51  ;;  %v32_v57 = vld [vmem:[%s928_s0 + $0x90] sm:$0xff]  ;;  %v29_v58 = vld [vmem:[%s928_s0 + $0x78] sm:$0xff] }
  0x1e   :  { %547 = vmatpush3.bf16.msra.mxu0 %v546_v24  ;;  %v31_v59 = vld [vmem:[%s928_s0 + $0x88] sm:$0xff]  ;;  %v18_v60 = vld [vmem:[%s928_s0 + $0x20] sm:$0xff]  ;;  %v28_v61 = vld [vmem:[%s928_s0 + $0x70] sm:$0xff] }
  0x1f   :  { %579 = vmatpush3.bf16.msra.mxu1 %v578_v25  ;;  %549 = vmatprep.subr.bf16.mxu0 %v548_v26  ;;  %v23_v62 = vld [vmem:[%s928_s0 + $0x48] sm:$0xff]  ;;  %v33_v63 = vld [vmem:[%s928_s0 + $0x98] sm:$0xff]  ;;  %v393_v1 = vld [vmem:[%s929_s2] ss:$0 sm:$0xff] }
  0x20   :  { %581 = vmatprep.subr.bf16.mxu1 %v580_v30 }
  0x22   :  { %551 = vmatpush3.bf16.msra.mxu0 %v550_v34 }
  0x23   :  { %583 = vmatpush3.bf16.msra.mxu1 %v582_v35  ;;  %585 = vmatprep.subr.bf16.mxu0 %v584_v36 }
  0x24   :  { %600 = vmatprep.subr.bf16.mxu1 %v584_v36 }
  0x25   :  { %191 = vmatmul.mubr.f32.vlgmr.msra.gmra.mrb[0].mxu0 %v14_v39 }
  0x26   :  { %276 = vmatmul.mubr.f32.vlgmr.msra.gmra.mrb[0].mxu1 %v16_v40  ;;  %587 = vmatpush3.bf16.msra.mxu0 %v584_v36 }
  0x27   :  { %604 = vmatpush3.bf16.msra.mxu1 %v584_v36  ;;  %195 = vmatprep.mubr.f32.mxu0 %v20_v41 }
  0x28   :  { %280 = vmatprep.mubr.f32.mxu1 %v22_v43  ;;  %589 = vmatprep.subr.bf16.mxu0 %v588_v42 }
  0x29   :  { %196 = vmatmul.mubr.f32.gmra.mrb[2].mxu0 %v19_v46  ;;  %601 = vmatprep.subr.bf16.mxu1 %v588_v42 }
  0x2a   :  { %281 = vmatmul.mubr.f32.gmra.mrb[2].mxu1 %v21_v47  ;;  %591 = vmatpush3.bf16.msra.mxu0 %v588_v42 }
  0x2b   :  { %605 = vmatpush3.bf16.msra.mxu1 %v588_v42  ;;  %200 = vmatprep.mubr.f32.mxu0 %v25_v48 }
  0x2c   :  { %285 = vmatprep.mubr.f32.mxu1 %v27_v50  ;;  %593 = vmatprep.subr.bf16.mxu0 %v592_v49 }
  0x2d   :  { %201 = vmatmul.mubr.f32.gmra.mrb[4].mxu0 %v24_v53  ;;  %602 = vmatprep.subr.bf16.mxu1 %v592_v49 }
  0x2e   :  { %286 = vmatmul.mubr.f32.gmra.mrb[4].mxu1 %v26_v54  ;;  %595 = vmatpush3.bf16.msra.mxu0 %v592_v49 }
  0x2f   :  { %606 = vmatpush3.bf16.msra.mxu1 %v592_v49  ;;  %205 = vmatprep.mubr.f32.mxu0 %v30_v55 }
  0x30   :  { %290 = vmatprep.mubr.f32.mxu1 %v32_v57  ;;  %597 = vmatprep.subr.bf16.mxu0 %v596_v56 }
  0x31   :  { %206 = vmatmul.mubr.f32.gmra.mrb[6].mxu0 %v29_v58  ;;  %603 = vmatprep.subr.bf16.mxu1 %v596_v56 }
  0x32   :  { %291 = vmatmul.mubr.f32.gmra.mrb[6].mxu1 %v31_v59  ;;  %599 = vmatpush3.bf16.msra.mxu0 %v596_v56 }
  0x33   :  { %607 = vmatpush3.bf16.msra.mxu1 %v596_v56  ;;  %514 = vmatprep.mubr.msk.f32.mxu0 %vm113_vm0, %v18_v60 }
  0x34   :  { %517 = vmatprep.mubr.msk.f32.mxu1 %vm113_vm0, %v28_v61 }
  0x35   :  { %515 = vmatmul.mubr.msk.f32.vlgmr.msra.gmra.mrb[8].mxu0 %vm113_vm0, %v23_v62 }
  0x36   :  { %518 = vmatmul.mubr.msk.f32.vlgmr.msra.gmra.mrb[8].mxu1 %vm113_vm0, %v33_v63 }
  0xf8   :  { %v430_v0 = vpop.f32.mrb[0].mxu0 }
  0xf9   :  { %v431_v2 = vpop.f32.mrb[1].mxu0  ;;  %v474_v3 = vpop.f32.mrb[0].mxu1 }
  0xfa   :  { %v432_v4 = vadd.f32 %v431_v2, %v430_v0  ;;  %v475_v5 = vpop.f32.mrb[1].mxu1 }
  0xfb   :  { %v476_v6 = vadd.f32 %v475_v5, %v474_v3 }
  0xfc   :  { %v193_v7 = vadd.f32 %v432_v4, %v393_v1  ;;  %v433_v8 = vpop.f32.mrb[2].mxu0 }
  0xfd   :  { %v434_v9 = vpop.f32.mrb[3].mxu0  ;;  %v477_v10 = vpop.f32.mrb[2].mxu1 }
  0xfe   :  { %v435_v11 = vadd.f32 %v434_v9, %v433_v8  ;;  %v478_v12 = vpop.f32.mrb[3].mxu1  ;;  %v278_v13 = vadd.f32 %v476_v6, %v193_v7 }
  0xff   :  { %v479_v14 = vadd.f32 %v478_v12, %v477_v10 }
 0x100   :  { %v198_v15 = vadd.f32 %v435_v11, %v393_v1  ;;  %v436_v16 = vpop.f32.mrb[4].mxu0 }
 0x101   :  { %v437_v17 = vpop.f32.mrb[5].mxu0  ;;  %v480_v18 = vpop.f32.mrb[4].mxu1 }
 0x102   :  { %v438_v19 = vadd.f32 %v437_v17, %v436_v16  ;;  %v481_v20 = vpop.f32.mrb[5].mxu1  ;;  %v283_v21 = vadd.f32 %v479_v14, %v198_v15 }
 0x103   :  { %v482_v22 = vadd.f32 %v481_v20, %v480_v18 }
 0x104   :  { %v203_v23 = vadd.f32 %v438_v19, %v393_v1  ;;  %v439_v24 = vpop.f32.mrb[6].mxu0 }
 0x105   :  { %v440_v25 = vpop.f32.mrb[7].mxu0  ;;  %v483_v26 = vpop.f32.mrb[6].mxu1 }
 0x106   :  { %v441_v27 = vadd.f32 %v440_v25, %v439_v24  ;;  %v484_v28 = vpop.f32.mrb[7].mxu1  ;;  %v288_v29 = vadd.f32 %v482_v22, %v203_v23 }
 0x107   :  { %v485_v30 = vadd.f32 %v484_v28, %v483_v26 }
 0x108   :  { %v208_v31 = vadd.f32 %v441_v27, %v393_v1  ;;  %v516_v32 = vpop.f32.mrb[8].mxu0 }
 0x109   :  { %v368_v33 = vadd.f32 %v516_v32, %v283_v21  ;;  %v519_v34 = vpop.f32.mrb[8].mxu1  ;;  %v362_v35 = vpop.f32.mrb[9].mxu0 }
 0x10a   :  { %v293_v36 = vadd.f32 %v485_v30, %v208_v31  ;;  %v363_v37 = vadd.f32 %v362_v35, %v278_v13  ;;  %v372_v38 = vpop.f32.mrb[9].mxu1 }
 0x10b   :  { %v382_v39 = vmax.f32 %v368_v33, 0.0  ;;  %v373_v40 = vadd.f32 %v372_v38, %v288_v29 }
 0x10c   :  { %v378_v41 = vadd.f32 %v519_v34, %v293_v36  ;;  %v381_v42 = vmax.f32 %v363_v37, 0.0 }
 0x10d   :  { %386 = vst.msk [vmem:[%s930_s3 + $0x8] sm:$0xff] %vm113_vm0, %v382_v39  ;;  %v383_v43 = vmax.f32 %v373_v40, 0.0 }
 0x10e   :  { %v384_v44 = vmax.f32 %v378_v41, 0.0  ;;  %385 = vst.msk [vmem:[%s930_s3] sm:$0xff] %vm113_vm0, %v381_v42 }
 0x10f   :  { %387 = vst.msk [vmem:[%s930_s3 + $0x10] sm:$0xff] %vm113_vm0, %v383_v43 }
 0x110   :  { %388 = vst.msk [vmem:[%s930_s3 + $0x18] sm:$0xff] %vm113_vm0, %v384_v44 }

// kernel: map_encoder_forward.7
= control target key start
LH: loop header
LB: loop body
LE: loop exit
PB: predicated region body
PF: predicated region fallthrough
CT: control target
= control target key end

     0   :  { %vm498_vm0 = vmmov 0   ;;  %vm98_vm1 = vcmask 523264   ;;  %s759_s1 = inlined_call_operand.vmem [shape: f32[576,64], index: 1, kind: input, shape index: {}]   ;;  %s760_s0 = inlined_call_operand.vmem [shape: f32[8,576], index: 0, kind: input, shape index: {}]   ;;  %s761_s2 = inlined_call_operand.vmem [shape: f32[1,64], index: 2, kind: input, shape index: {}]   ;;  %s762_s3 = inlined_call_operand.vmem [shape: f32[8,64], index: 3, kind: output, shape index: {}]  }
   0x1   :  { %v35_v0 = vld [vmem:[%s759_s1 + $0x80] sm:$0xff]  ;;  %v36_v1 = vld [vmem:[%s759_s1 + $0x88] sm:$0xff]  ;;  %v37_v11 = vld [vmem:[%s759_s1 + $0x90] sm:$0xff] }
   0x2   :  { %v19_v2 = vld [vmem:[%s759_s1] sm:$0xff]  ;;  %v418_v3 = vpack.c.bf16 %v36_v1, %v35_v0  ;;  %v20_v4 = vld [vmem:[%s759_s1 + $0x8] sm:$0xff]  ;;  %v38_v13 = vld [vmem:[%s759_s1 + $0x98] sm:$0xff] }
   0x3   :  { %v67_v5 = vld [vmem:[%s759_s1 + $0x180] sm:$0xff]  ;;  %v68_v6 = vld [vmem:[%s759_s1 + $0x188] sm:$0xff]  ;;  %v420_v7 = vpack.c.bf16 %v20_v4, %v19_v2  ;;  %v21_v14 = vld [vmem:[%s759_s1 + $0x10] sm:$0xff]  ;;  %v422_v16 = vpack.c.bf16 %v38_v13, %v37_v11 }
   0x4   :  { %v450_v8 = vpack.c.bf16 %v68_v6, %v67_v5  ;;  %v51_v9 = vld [vmem:[%s759_s1 + $0x100] sm:$0xff]  ;;  %v52_v10 = vld [vmem:[%s759_s1 + $0x108] sm:$0xff]  ;;  %419 = vmatprep.subr.bf16.mxu0 %v418_v3  ;;  %v22_v15 = vld [vmem:[%s759_s1 + $0x18] sm:$0xff] }
   0x5   :  { %v452_v12 = vpack.c.bf16 %v52_v10, %v51_v9  ;;  %421 = vmatpush3.bf16.msra.mxu0 %v420_v7  ;;  %v424_v17 = vpack.c.bf16 %v22_v15, %v21_v14  ;;  %v69_v18 = vld [vmem:[%s759_s1 + $0x190] sm:$0xff]  ;;  %v70_v19 = vld [vmem:[%s759_s1 + $0x198] sm:$0xff]  ;;  %v39_v23 = vld [vmem:[%s759_s1 + $0xa0] sm:$0xff] }
   0x6   :  { %451 = vmatprep.subr.bf16.mxu1 %v450_v8  ;;  %v53_v20 = vld [vmem:[%s759_s1 + $0x110] sm:$0xff]  ;;  %v454_v21 = vpack.c.bf16 %v70_v19, %v69_v18  ;;  %v54_v22 = vld [vmem:[%s759_s1 + $0x118] sm:$0xff]  ;;  %v40_v24 = vld [vmem:[%s759_s1 + $0xa8] sm:$0xff]  ;;  %423 = vmatprep.subr.bf16.mxu0 %v422_v16 }
   0x7   :  { %453 = vmatpush3.bf16.msra.mxu1 %v452_v12  ;;  %v456_v25 = vpack.c.bf16 %v54_v22, %v53_v20  ;;  %v426_v26 = vpack.c.bf16 %v40_v24, %v39_v23  ;;  %v23_v27 = vld [vmem:[%s759_s1 + $0x20] sm:$0xff]  ;;  %v24_v28 = vld [vmem:[%s759_s1 + $0x28] sm:$0xff]  ;;  %v41_v35 = vld [vmem:[%s759_s1 + $0xb0] sm:$0xff] }
   0x8   :  { %v71_v29 = vld [vmem:[%s759_s1 + $0x1a0] sm:$0xff]  ;;  %455 = vmatprep.subr.bf16.mxu1 %v454_v21  ;;  %v72_v30 = vld [vmem:[%s759_s1 + $0x1a8] sm:$0xff]  ;;  %v428_v33 = vpack.c.bf16 %v24_v28, %v23_v27  ;;  %v42_v36 = vld [vmem:[%s759_s1 + $0xb8] sm:$0xff] }
   0x9   :  { %v55_v31 = vld [vmem:[%s759_s1 + $0x120] sm:$0xff]  ;;  %v56_v32 = vld [vmem:[%s759_s1 + $0x128] sm:$0xff]  ;;  %425 = vmatpush3.bf16.msra.mxu0 %v424_v17  ;;  %v458_v34 = vpack.c.bf16 %v72_v30, %v71_v29  ;;  %v25_v37 = vld [vmem:[%s759_s1 + $0x30] sm:$0xff]  ;;  %v430_v39 = vpack.c.bf16 %v42_v36, %v41_v35 }
   0xa   :  { %427 = vmatprep.subr.bf16.mxu0 %v426_v26  ;;  %v460_v38 = vpack.c.bf16 %v56_v32, %v55_v31  ;;  %v26_v40 = vld [vmem:[%s759_s1 + $0x38] sm:$0xff]  ;;  %v73_v41 = vld [vmem:[%s759_s1 + $0x1b0] sm:$0xff]  ;;  %v43_v46 = vld [vmem:[%s759_s1 + $0xc0] sm:$0xff] }
   0xb   :  { %457 = vmatpush3.bf16.msra.mxu1 %v456_v25  ;;  %v74_v42 = vld [vmem:[%s759_s1 + $0x1b8] sm:$0xff]  ;;  %v57_v44 = vld [vmem:[%s759_s1 + $0x130] sm:$0xff]  ;;  %v44_v47 = vld [vmem:[%s759_s1 + $0xc8] sm:$0xff]  ;;  %v432_v48 = vpack.c.bf16 %v26_v40, %v25_v37 }
   0xc   :  { %459 = vmatprep.subr.bf16.mxu1 %v458_v34  ;;  %v462_v43 = vpack.c.bf16 %v74_v42, %v73_v41  ;;  %v58_v45 = vld [vmem:[%s759_s1 + $0x138] sm:$0xff]  ;;  %v75_v49 = vld [vmem:[%s759_s1 + $0x1c0] sm:$0xff]  ;;  %v76_v50 = vld [vmem:[%s759_s1 + $0x1c8] sm:$0xff]  ;;  %v434_v52 = vpack.c.bf16 %v44_v47, %v43_v46 }
   0xd   :  { %429 = vmatpush3.bf16.msra.mxu0 %v428_v33  ;;  %v464_v51 = vpack.c.bf16 %v58_v45, %v57_v44  ;;  %v27_v53 = vld [vmem:[%s759_s1 + $0x40] sm:$0xff]  ;;  %v28_v54 = vld [vmem:[%s759_s1 + $0x48] sm:$0xff]  ;;  %v466_v56 = vpack.c.bf16 %v76_v50, %v75_v49  ;;  %v45_v58 = vld [vmem:[%s759_s1 + $0xd0] sm:$0xff]  ;;  %v499_v45 = vmov 0.0  }
   0xe   :  { %431 = vmatprep.subr.bf16.mxu0 %v430_v39  ;;  %v59_v55 = vld [vmem:[%s759_s1 + $0x140] sm:$0xff]  ;;  %v60_v57 = vld [vmem:[%s759_s1 + $0x148] sm:$0xff]  ;;  %v46_v59 = vld [vmem:[%s759_s1 + $0xd8] sm:$0xff]  ;;  %v436_v62 = vpack.c.bf16 %v28_v54, %v27_v53 }
   0xf   :  { %461 = vmatpush3.bf16.msra.mxu1 %v460_v38  ;;  %v77_v60 = vld [vmem:[%s759_s1 + $0x1d0] sm:$0xff]  ;;  %v78_v61 = vld [vmem:[%s759_s1 + $0x1d8] sm:$0xff]  ;;  %v468_v63 = vpack.c.bf16 %v60_v57, %v59_v55  ;;  %v438_v0 = vpack.c.bf16 %v46_v59, %v45_v58  ;;  %v47_v6 = vld [vmem:[%s759_s1 + $0xe0] sm:$0xff]  ;;  %v497_v38 = vmov 0.0|0.0  }
  0x10   :  { %463 = vmatprep.subr.bf16.mxu1 %v462_v43  ;;  %v29_v1 = vld [vmem:[%s759_s1 + $0x50] sm:$0xff]  ;;  %v30_v2 = vld [vmem:[%s759_s1 + $0x58] sm:$0xff]  ;;  %v470_v4 = vpack.c.bf16 %v78_v61, %v77_v60  ;;  %v48_v7 = vld [vmem:[%s759_s1 + $0xe8] sm:$0xff] }
  0x11   :  { %433 = vmatpush3.bf16.msra.mxu0 %v432_v48  ;;  %v61_v3 = vld [vmem:[%s759_s1 + $0x150] sm:$0xff]  ;;  %v62_v5 = vld [vmem:[%s759_s1 + $0x158] sm:$0xff]  ;;  %v79_v8 = vld [vmem:[%s759_s1 + $0x1e0] sm:$0xff]  ;;  %v440_v10 = vpack.c.bf16 %v30_v2, %v29_v1  ;;  %v442_v14 = vpack.c.bf16 %v48_v7, %v47_v6 }
  0x12   :  { %435 = vmatprep.subr.bf16.mxu0 %v434_v52  ;;  %v80_v9 = vld [vmem:[%s759_s1 + $0x1e8] sm:$0xff]  ;;  %v31_v11 = vld [vmem:[%s759_s1 + $0x60] sm:$0xff]  ;;  %v472_v13 = vpack.c.bf16 %v62_v5, %v61_v3  ;;  %v49_v19 = vld [vmem:[%s759_s1 + $0xf0] sm:$0xff] }
  0x13   :  { %465 = vmatpush3.bf16.msra.mxu1 %v464_v51  ;;  %v15_v12 = vld [vmem:[%s760_s0 + $0x8] sm:$0xff]  ;;  %v63_v16 = vld [vmem:[%s759_s1 + $0x160] sm:$0xff]  ;;  %v474_v18 = vpack.c.bf16 %v80_v9, %v79_v8  ;;  %v50_v20 = vld [vmem:[%s759_s1 + $0xf8] sm:$0xff] }
  0x14   :  { %467 = vmatprep.subr.bf16.mxu1 %v466_v56  ;;  %v32_v15 = vld [vmem:[%s759_s1 + $0x68] sm:$0xff]  ;;  %166 = vmatprep.mubr.f32.mxu0 %v15_v12  ;;  %v17_v21 = vld [vmem:[%s760_s0 + $0x18] sm:$0xff]  ;;  %v81_v22 = vld [vmem:[%s759_s1 + $0x1f0] sm:$0xff]  ;;  %v446_v26 = vpack.c.bf16 %v50_v20, %v49_v19 }
  0x15   :  { %437 = vmatpush3.bf16.msra.mxu0 %v436_v62  ;;  %v64_v17 = vld [vmem:[%s759_s1 + $0x168] sm:$0xff]  ;;  %v82_v23 = vld [vmem:[%s759_s1 + $0x1f8] sm:$0xff]  ;;  %236 = vmatprep.mubr.f32.mxu1 %v17_v21  ;;  %v444_v24 = vpack.c.bf16 %v32_v15, %v31_v11  ;;  %v33_v27 = vld [vmem:[%s759_s1 + $0x70] sm:$0xff] }
  0x16   :  { %439 = vmatprep.subr.bf16.mxu0 %v438_v0  ;;  %v476_v25 = vpack.c.bf16 %v64_v17, %v63_v16  ;;  %v34_v28 = vld [vmem:[%s759_s1 + $0x78] sm:$0xff]  ;;  %v478_v29 = vpack.c.bf16 %v82_v23, %v81_v22  ;;  %v65_v30 = vld [vmem:[%s759_s1 + $0x170] sm:$0xff]  ;;  %v83_v34 = vld [vmem:[%s759_s1 + $0x200] sm:$0xff] }
  0x17   :  { %469 = vmatpush3.bf16.msra.mxu1 %v468_v63  ;;  %v66_v31 = vld [vmem:[%s759_s1 + $0x178] sm:$0xff]  ;;  %v448_v32 = vpack.c.bf16 %v34_v28, %v33_v27  ;;  %v84_v35 = vld [vmem:[%s759_s1 + $0x208] sm:$0xff]  ;;  %v14_v36 = vld [vmem:[%s760_s0] sm:$0xff] }
  0x18   :  { %471 = vmatprep.subr.bf16.mxu1 %v470_v4  ;;  %v480_v33 = vpack.c.bf16 %v66_v31, %v65_v30  ;;  %v483_v37 = vpack.c.bf16 %v84_v35, %v83_v34  ;;  %v16_v39 = vld [vmem:[%s760_s0 + $0x10] sm:$0xff]  ;;  %v86_v41 = vld [vmem:[%s759_s1 + $0x218] sm:$0xff]  ;;  %v87_v43 = vld [vmem:[%s759_s1 + $0x220] sm:$0xff] }
  0x19   :  { %441 = vmatpush3.bf16.msra.mxu0 %v440_v10  ;;  %v85_v40 = vld [vmem:[%s759_s1 + $0x210] sm:$0xff]  ;;  %v88_v44 = vld [vmem:[%s759_s1 + $0x228] sm:$0xff]  ;;  %v90_v48 = vld [vmem:[%s759_s1 + $0x238] sm:$0xff] }
  0x1a   :  { %443 = vmatprep.subr.bf16.mxu0 %v442_v14  ;;  %v486_v42 = vpack.c.bf16 %v86_v41, %v85_v40  ;;  %v489_v46 = vpack.c.bf16 %v88_v44, %v87_v43  ;;  %v89_v47 = vld [vmem:[%s759_s1 + $0x230] sm:$0xff]  ;;  %v18_v50 = vld [vmem:[%s760_s0 + $0x20] sm:$0xff] }
  0x1b   :  { %473 = vmatpush3.bf16.msra.mxu1 %v472_v13  ;;  %v492_v49 = vpack.c.bf16 %v90_v48, %v89_v47  ;;  %v318_v52 = vld [vmem:[%s761_s2] ss:$0 sm:$0xff] }
  0x1c   :  { %475 = vmatprep.subr.bf16.mxu1 %v474_v18 }
  0x1d   :  { %445 = vmatpush3.bf16.msra.mxu0 %v444_v24 }
  0x1e   :  { %447 = vmatprep.subr.bf16.mxu0 %v446_v26 }
  0x1f   :  { %477 = vmatpush3.bf16.msra.mxu1 %v476_v25 }
  0x20   :  { %479 = vmatprep.subr.bf16.mxu1 %v478_v29 }
  0x21   :  { %449 = vmatpush3.bf16.msra.mxu0 %v448_v32 }
  0x22   :  { %482 = vmatprep.subr.bf16.mxu0 %v497_v38 }
  0x23   :  { %481 = vmatpush3.bf16.msra.mxu1 %v480_v33 }
  0x24   :  { %167 = vmatmul.mubr.f32.vlgmr.msra.gmra.mrb[0].mxu0 %v14_v36 }
  0x25   :  { %484 = vmatpush3.bf16.msra.mxu0 %v483_v37  ;;  %415 = vmatprep.mubr.msk.f32.mxu0 %vm498_vm0, %v499_v45 }
  0x26   :  { %237 = vmatmul.mubr.f32.vlgmr.msra.gmra.mrb[0].mxu1 %v16_v39  ;;  %485 = vmatprep.subr.bf16.mxu0 %v497_v38 }
  0x29   :  { %487 = vmatpush3.bf16.msra.mxu0 %v486_v42 }
  0x2a   :  { %488 = vmatprep.subr.bf16.mxu0 %v497_v38 }
  0x2d   :  { %490 = vmatpush3.bf16.msra.mxu0 %v489_v46 }
  0x2e   :  { %491 = vmatprep.subr.bf16.mxu0 %v497_v38 }
  0x31   :  { %493 = vmatpush3.bf16.msra.mxu0 %v492_v49 }
  0x34   :  { %416 = vmatmul.mubr.msk.f32.vlgmr.msra.gmra.mrb[2].mxu0 %vm98_vm1, %v18_v50 }
  0xf7   :  { %v352_v51 = vpop.f32.mrb[0].mxu0 }
  0xf8   :  { %v353_v53 = vpop.f32.mrb[1].mxu0 }
  0xf9   :  { %v387_v54 = vpop.f32.mrb[0].mxu1  ;;  %v354_v55 = vadd.f32 %v353_v53, %v352_v51 }
  0xfa   :  { %v388_v56 = vpop.f32.mrb[1].mxu1 }
  0xfb   :  { %v389_v57 = vadd.f32 %v388_v56, %v387_v54  ;;  %v169_v58 = vadd.f32 %v354_v55, %v318_v52 }
  0xfd   :  { %v239_v59 = vadd.f32 %v389_v57, %v169_v58 }
 0x107   :  { %v308_v60 = vpop.f32.mrb[2].mxu0 }
 0x108   :  { %v309_v61 = vadd.f32 %v308_v60, %v239_v59  ;;  %v417_v62 = vpop.f32.mrb[3].mxu0 }
 0x10a   :  { %v312_v63 = vmax.f32 %v309_v61, 0.0 }
 0x10c   :  { %313 = vst.msk [vmem:[%s762_s3] sm:$0xff] %vm98_vm1, %v312_v63 }

// kernel: map_encoder_forward.9
= control target key start
LH: loop header
LB: loop body
LE: loop exit
PB: predicated region body
PF: predicated region fallthrough
CT: control target
= control target key end

     0   :  { %8 = vsyncpa [#allocation3], 0  ;;  %s460_s12 = smov 0   ;;  %s517_s0 = inlined_call_operand.vmem [shape: f32[2,64], index: 0, kind: input, shape index: {}]   ;;  %s518_s1 = inlined_call_operand.vmem [shape: f32[21,64,64], index: 1, kind: input, shape index: {}]   ;;  %s519_s2 = inlined_call_operand.vmem [shape: f32[21,1,64], index: 2, kind: input, shape index: {}]   ;;  %s520_s3 = inlined_call_operand.hbm [shape: f32[2,64], index: 3, kind: output, shape index: {}]  }
   0x1 LB: > { %s466_s13 = sadd.s32 4294967295, %s434_s12   ;;  %p329_p0 = scmp.ge.s32.totalorder %s434_s12, 1  ;;  %s434_s12 = sphi %s460_s12, %s14_s12  }
   0x2   : > { %p141_p1 = scmp.lt.s32.totalorder %s434_s12, 22 }
   0x4   : > { %p142_p2 = pnand %p329_p0, %p141_p1 }
   0x5   : > { %p163_p3 = scmp.lt.s32.totalorder (!%p142_p2), %s466_s13, 20  ;;  %p332_p4 = scmp.ne.s32.totalorder (!%p142_p2), %s466_s13, 0 }
   0x6   : > { %145 = sbr.rel (%p142_p2) target bundleno = 270 (0x10e), region = 32 }
   0xd   : > { %s472_s14 = scalar_select %p163_p3, %s466_s13, 20 }
   0xe   : > { %174 = sbr.rel (%p332_p4) target bundleno = 21 (0x15), region = 36  ;;  %v175_v0 = vld [vmem:[%s517_s0] sm:$0x3] (!%p332_p4)  ;;  %vm176_vm0 = vcmask (!%p332_p4), 517120  }
   0xf   : > { %s339_s15 = sshll.u32 %s472_s14, 6  ;;  %s170_s18 = scalar_lea.vmem %s519_s2, %s472_s14  ;;  %177 = vst.msk [vmem:[#allocation2] sm:$0x3] (!%p332_p4), %vm176_vm0, %v175_v0 }
  0x10   : > { %s167_s21 = scalar_lea.vmem %s518_s1, %s339_s15 }
  0x15 PF: > { %v179_v1 = vld [vmem:[%s167_s21] sm:$0xff]  ;;  %v180_v2 = vld [vmem:[%s167_s21 + $0x8] sm:$0xff]  ;;  %v181_v3 = vld [vmem:[%s167_s21 + $0x10] sm:$0xff]  ;;  %v436_v4 = vmov 0.0|0.0   ;;  %vm437_vm1 = vmmov 0   ;;  %v438_v7 = vmov 0.0  }
  0x16   : > { %368 = vmatprep.subr.bf16.mxu0 %v436_v4  ;;  %v369_v5 = vpack.c.bf16 %v180_v2, %v179_v1  ;;  %v182_v6 = vld [vmem:[%s167_s21 + $0x18] sm:$0xff]  ;;  %365 = vmatprep.mubr.msk.f32.mxu0 %vm437_vm1, %v438_v7  ;;  %v183_v9 = vld [vmem:[%s167_s21 + $0x20] sm:$0xff]  ;;  %v184_v10 = vld [vmem:[%s167_s21 + $0x28] sm:$0xff]  ;;  %vm194_vm2 = vcmask 523264   ;;  %s439_s26 = smov [#allocation2]   ;;  %vm269_vm3 = vcmask 517120  }
  0x17   : > { %v372_v8 = vpack.c.bf16 %v182_v6, %v181_v3  ;;  %v375_v11 = vpack.c.bf16 %v184_v10, %v183_v9  ;;  %v185_v12 = vld [vmem:[%s167_s21 + $0x30] sm:$0xff]  ;;  %v186_v13 = vld [vmem:[%s167_s21 + $0x38] sm:$0xff]  ;;  %v178_v15 = vld [vmem:[#allocation2] sm:$0x3]  ;;  %s278_s27 = sshll.u32 %s439_s26, 4  ;;  %p384_p5 = scmp.eq.s32.totalorder %s466_s13, 20  ;;  %s279_s27 = int_to_ptr.vmem [resolvable:$true] %s278_s27 }
  0x18   : > { %370 = vmatpush3.bf16.msra.mxu0 %v369_v5  ;;  %v378_v14 = vpack.c.bf16 %v186_v13, %v185_v12  ;;  %v333_v16 = vld [vmem:[%s170_s18] ss:$0 sm:$0xff]  ;;  %s398_s28 = scalar_lea.vmem %s279_s27, 32  ;;  %p405_p9 = scmp.lt.s32.totalorder %s279_s27, %s279_s27 }
  0x19   : > { %371 = vmatprep.subr.bf16.mxu0 %v436_v4  ;;  %p399_p6 = scmp.ne.s32.totalorder %s279_s27, %s398_s28  ;;  %p406_p10 = scmp.lt.s32.totalorder %s398_s28, %s398_s28 }
  0x1b   : > { %p400_p7 = pnand %p399_p6, %p384_p5  ;;  %p407_p11 = por %p406_p10, %p405_p9 }
  0x1c   : > { %373 = vmatpush3.bf16.msra.mxu0 %v372_v8 }
  0x1d   : > { %374 = vmatprep.subr.bf16.mxu0 %v436_v4  ;;  %p401_p8 = pneg %p400_p7 }
  0x1f   : > { %p408_p12 = pnand %p407_p11, %p401_p8 }
  0x20   : > { %376 = vmatpush3.bf16.msra.mxu0 %v375_v11 }
  0x21   : > { %377 = vmatprep.subr.bf16.mxu0 %v436_v4 }
  0x24   : > { %379 = vmatpush3.bf16.msra.mxu0 %v378_v14 }
  0x27   : > { %366 = vmatmul.mubr.msk.f32.vlgmr.msra.gmra.mrb[0].mxu0 %vm194_vm2, %v178_v15 }
  0xfa   : > { %v264_v17 = vpop.f32.mrb[0].mxu0 }
  0xfb   : > { %v265_v18 = vadd.f32 %v333_v16, %v264_v17  ;;  %v367_v19 = vpop.f32.mrb[1].mxu0 }
  0xfd   : > { %v268_v20 = vmax.f32 %v265_v18, 0.0 }
  0xff   : > { %270 = vst.msk [vmem:[#allocation2] sm:$0x3] %vm269_vm3, %v268_v20 }
 0x100   : > { %411 = shalt.err (!%p408_p12)
}
 0x101   : > { %s412_s4 = scalar_lea.hbm %s520_s3, 32 }
 0x102   : > { %p413_p13 = scmp.ne.s32.totalorder %s520_s3, %s412_s4  ;;  %p418_p2 = scmp.lt.u32.totalorder %s412_s4, %s520_s3 }
 0x104   : > { %p414_p0 = pnand %p413_p13, %p384_p5 }
 0x106   : > { %p415_p1 = pneg %p414_p0 }
 0x108   : > { %p420_p3 = pnand %p418_p2, %p415_p1 }
 0x10a   : > { %423 = shalt.err (!%p420_p3)
}
 0x10b   : > { %381 = dma.vmem_to_hbm [thread:$0]  (%p384_p5), %s279_s27, 32, %s520_s3, [#allocation3]  }
 0x10c   : > { %429 = dma.done.wait (%p384_p5), [#allocation3], 32  }
 0x10d   : > { %431 = vsyncadd (%p384_p5), [#allocation3], 4294967264 }
 0x10e PF: > { %s14_s12 = sadd.s32 1, %s434_s12  }
 0x10f   : > { %p11_p4 = scmp.ge.s32.totalorder %s14_s12, 23  }
 0x111   :  { %13 = sbr.rel (!%p11_p4) target bundleno = 1 (0x1), region = 66 }
 0x118   :  { %291 = vsyncpa [#allocation3], 1 }
 0x119   :  { %293 = vsyncpa [#allocation3 + $0x1], 1 }

// kernel: map_encoder_forward.8
= control target key start
LH: loop header
LB: loop body
LE: loop exit
PB: predicated region body
PF: predicated region fallthrough
CT: control target
= control target key end

     0   :  { %v527_v43 = vmov 1983009808   ;;  %v101_v45 = vlaneseq  ;;  %vm529_vm0 = vmmov 0   ;;  %vm125_vm1 = vcmask 523264   ;;  %s779_s1 = inlined_call_operand.vmem [shape: f32[576,64], index: 1, kind: input, shape index: {}]   ;;  %s780_s0 = inlined_call_operand.vmem [shape: f32[2,576], index: 0, kind: input, shape index: {}]   ;;  %s781_s2 = inlined_call_operand.vmem [shape: f32[1,64], index: 2, kind: input, shape index: {}]   ;;  %s782_s3 = inlined_call_operand.vmem [shape: f32[2,64], index: 3, kind: output, shape index: {}]  }
   0x1   :  { %v32_v0 = vld [vmem:[%s779_s1 + $0x80] sm:$0xff]  ;;  %v33_v1 = vld [vmem:[%s779_s1 + $0x88] sm:$0xff]  ;;  %v34_v11 = vld [vmem:[%s779_s1 + $0x90] sm:$0xff]  ;;  %v99_v44 = vunpack.c.l.s4 %v527_v43  ;;  %vm339_vm2 = vcmask 517120  }
   0x2   :  { %v16_v2 = vld [vmem:[%s779_s1] sm:$0xff]  ;;  %v446_v3 = vpack.c.bf16 %v33_v1, %v32_v0  ;;  %v17_v4 = vld [vmem:[%s779_s1 + $0x8] sm:$0xff]  ;;  %v35_v13 = vld [vmem:[%s779_s1 + $0x98] sm:$0xff]  ;;  %v102_v60 = vshrl.u32 %v101_v45, 7 }
   0x3   :  { %v64_v5 = vld [vmem:[%s779_s1 + $0x180] sm:$0xff]  ;;  %v65_v6 = vld [vmem:[%s779_s1 + $0x188] sm:$0xff]  ;;  %v448_v7 = vpack.c.bf16 %v17_v4, %v16_v2  ;;  %v18_v14 = vld [vmem:[%s779_s1 + $0x10] sm:$0xff]  ;;  %v450_v16 = vpack.c.bf16 %v35_v13, %v34_v11  ;;  %v100_v59 = vunpack.c.0.s8 %v99_v44 }
   0x4   :  { %v478_v8 = vpack.c.bf16 %v65_v6, %v64_v5  ;;  %v48_v9 = vld [vmem:[%s779_s1 + $0x100] sm:$0xff]  ;;  %v49_v10 = vld [vmem:[%s779_s1 + $0x108] sm:$0xff]  ;;  %447 = vmatprep.subr.bf16.mxu0 %v446_v3  ;;  %v19_v15 = vld [vmem:[%s779_s1 + $0x18] sm:$0xff] }
   0x5   :  { %v480_v12 = vpack.c.bf16 %v49_v10, %v48_v9  ;;  %449 = vmatpush3.bf16.msra.mxu0 %v448_v7  ;;  %v452_v17 = vpack.c.bf16 %v19_v15, %v18_v14  ;;  %v66_v18 = vld [vmem:[%s779_s1 + $0x190] sm:$0xff]  ;;  %v67_v19 = vld [vmem:[%s779_s1 + $0x198] sm:$0xff]  ;;  %v36_v23 = vld [vmem:[%s779_s1 + $0xa0] sm:$0xff]  ;;  %v103_v10 = vsub.s32 %v100_v59, %v102_v60 }
   0x6   :  { %479 = vmatprep.subr.bf16.mxu1 %v478_v8  ;;  %v50_v20 = vld [vmem:[%s779_s1 + $0x110] sm:$0xff]  ;;  %v482_v21 = vpack.c.bf16 %v67_v19, %v66_v18  ;;  %v51_v22 = vld [vmem:[%s779_s1 + $0x118] sm:$0xff]  ;;  %v37_v24 = vld [vmem:[%s779_s1 + $0xa8] sm:$0xff]  ;;  %451 = vmatprep.subr.bf16.mxu0 %v450_v16 }
   0x7   :  { %481 = vmatpush3.bf16.msra.mxu1 %v480_v12  ;;  %v484_v25 = vpack.c.bf16 %v51_v22, %v50_v20  ;;  %v454_v26 = vpack.c.bf16 %v37_v24, %v36_v23  ;;  %v20_v27 = vld [vmem:[%s779_s1 + $0x20] sm:$0xff]  ;;  %v21_v28 = vld [vmem:[%s779_s1 + $0x28] sm:$0xff]  ;;  %v38_v35 = vld [vmem:[%s779_s1 + $0xb0] sm:$0xff] }
   0x8   :  { %v68_v29 = vld [vmem:[%s779_s1 + $0x1a0] sm:$0xff]  ;;  %483 = vmatprep.subr.bf16.mxu1 %v482_v21  ;;  %v69_v30 = vld [vmem:[%s779_s1 + $0x1a8] sm:$0xff]  ;;  %v456_v33 = vpack.c.bf16 %v21_v28, %v20_v27  ;;  %v39_v36 = vld [vmem:[%s779_s1 + $0xb8] sm:$0xff] }
   0x9   :  { %v52_v31 = vld [vmem:[%s779_s1 + $0x120] sm:$0xff]  ;;  %v53_v32 = vld [vmem:[%s779_s1 + $0x128] sm:$0xff]  ;;  %453 = vmatpush3.bf16.msra.mxu0 %v452_v17  ;;  %v486_v34 = vpack.c.bf16 %v69_v30, %v68_v29  ;;  %v22_v37 = vld [vmem:[%s779_s1 + $0x30] sm:$0xff]  ;;  %v458_v39 = vpack.c.bf16 %v39_v36, %v38_v35 }
   0xa   :  { %455 = vmatprep.subr.bf16.mxu0 %v454_v26  ;;  %v488_v38 = vpack.c.bf16 %v53_v32, %v52_v31  ;;  %v23_v40 = vld [vmem:[%s779_s1 + $0x38] sm:$0xff]  ;;  %v70_v41 = vld [vmem:[%s779_s1 + $0x1b0] sm:$0xff]  ;;  %v40_v49 = vld [vmem:[%s779_s1 + $0xc0] sm:$0xff] }
   0xb   :  { %485 = vmatpush3.bf16.msra.mxu1 %v484_v25  ;;  %v71_v42 = vld [vmem:[%s779_s1 + $0x1b8] sm:$0xff]  ;;  %v54_v47 = vld [vmem:[%s779_s1 + $0x130] sm:$0xff]  ;;  %v41_v50 = vld [vmem:[%s779_s1 + $0xc8] sm:$0xff]  ;;  %v460_v51 = vpack.c.bf16 %v23_v40, %v22_v37 }
   0xc   :  { %487 = vmatprep.subr.bf16.mxu1 %v486_v34  ;;  %v490_v46 = vpack.c.bf16 %v71_v42, %v70_v41  ;;  %v55_v48 = vld [vmem:[%s779_s1 + $0x138] sm:$0xff]  ;;  %v72_v52 = vld [vmem:[%s779_s1 + $0x1c0] sm:$0xff]  ;;  %v73_v53 = vld [vmem:[%s779_s1 + $0x1c8] sm:$0xff]  ;;  %v462_v55 = vpack.c.bf16 %v41_v50, %v40_v49 }
   0xd   :  { %457 = vmatpush3.bf16.msra.mxu0 %v456_v33  ;;  %v492_v54 = vpack.c.bf16 %v55_v48, %v54_v47  ;;  %v24_v56 = vld [vmem:[%s779_s1 + $0x40] sm:$0xff]  ;;  %v25_v57 = vld [vmem:[%s779_s1 + $0x48] sm:$0xff]  ;;  %v494_v61 = vpack.c.bf16 %v73_v53, %v72_v52  ;;  %v42_v63 = vld [vmem:[%s779_s1 + $0xd0] sm:$0xff]  ;;  %v528_v47 = vmov 0.0|0.0   ;;  %v530_v53 = vmov 0.0  }
   0xe   :  { %459 = vmatprep.subr.bf16.mxu0 %v458_v39  ;;  %v56_v58 = vld [vmem:[%s779_s1 + $0x140] sm:$0xff]  ;;  %v57_v62 = vld [vmem:[%s779_s1 + $0x148] sm:$0xff]  ;;  %v43_v0 = vld [vmem:[%s779_s1 + $0xd8] sm:$0xff]  ;;  %v464_v3 = vpack.c.bf16 %v25_v57, %v24_v56 }
   0xf   :  { %489 = vmatpush3.bf16.msra.mxu1 %v488_v38  ;;  %v74_v1 = vld [vmem:[%s779_s1 + $0x1d0] sm:$0xff]  ;;  %v75_v2 = vld [vmem:[%s779_s1 + $0x1d8] sm:$0xff]  ;;  %v496_v5 = vpack.c.bf16 %v57_v62, %v56_v58  ;;  %v466_v6 = vpack.c.bf16 %v43_v0, %v42_v63  ;;  %v44_v12 = vld [vmem:[%s779_s1 + $0xe0] sm:$0xff] }
  0x10   :  { %491 = vmatprep.subr.bf16.mxu1 %v490_v46  ;;  %v26_v4 = vld [vmem:[%s779_s1 + $0x50] sm:$0xff]  ;;  %v27_v7 = vld [vmem:[%s779_s1 + $0x58] sm:$0xff]  ;;  %v498_v11 = vpack.c.bf16 %v75_v2, %v74_v1  ;;  %v45_v13 = vld [vmem:[%s779_s1 + $0xe8] sm:$0xff] }
  0x11   :  { %461 = vmatpush3.bf16.msra.mxu0 %v460_v51  ;;  %v58_v8 = vld [vmem:[%s779_s1 + $0x150] sm:$0xff]  ;;  %v59_v9 = vld [vmem:[%s779_s1 + $0x158] sm:$0xff]  ;;  %v76_v14 = vld [vmem:[%s779_s1 + $0x1e0] sm:$0xff]  ;;  %v468_v16 = vpack.c.bf16 %v27_v7, %v26_v4  ;;  %v470_v19 = vpack.c.bf16 %v45_v13, %v44_v12 }
  0x12   :  { %463 = vmatprep.subr.bf16.mxu0 %v462_v55  ;;  %v77_v15 = vld [vmem:[%s779_s1 + $0x1e8] sm:$0xff]  ;;  %v500_v17 = vpack.c.bf16 %v59_v9, %v58_v8  ;;  %v14_v18 = vld [vmem:[%s780_s0] sm:$0xff]  ;;  %v46_v27 = vld [vmem:[%s779_s1 + $0xf0] sm:$0xff] }
  0x13   :  { %493 = vmatpush3.bf16.msra.mxu1 %v492_v54  ;;  %v28_v20 = vld [vmem:[%s779_s1 + $0x60] sm:$0xff]  ;;  %v29_v21 = vld [vmem:[%s779_s1 + $0x68] sm:$0xff]  ;;  %v104_v23 = vrot.slane %v14_v18, %v103_v10  ;;  %v97_v24 = vcombine.high %v14_v18, %v14_v18  ;;  %v502_v25 = vpack.c.bf16 %v77_v15, %v76_v14  ;;  %v47_v28 = vld [vmem:[%s779_s1 + $0xf8] sm:$0xff] }
  0x14   :  { %495 = vmatprep.subr.bf16.mxu1 %v494_v61  ;;  %v60_v22 = vld [vmem:[%s779_s1 + $0x160] sm:$0xff]  ;;  %v61_v26 = vld [vmem:[%s779_s1 + $0x168] sm:$0xff]  ;;  %v78_v29 = vld [vmem:[%s779_s1 + $0x1f0] sm:$0xff]  ;;  %v472_v33 = vpack.c.bf16 %v29_v21, %v28_v20  ;;  %v474_v35 = vpack.c.bf16 %v47_v28, %v46_v27 }
  0x15   :  { %465 = vmatpush3.bf16.msra.mxu0 %v464_v3  ;;  %v79_v30 = vld [vmem:[%s779_s1 + $0x1f8] sm:$0xff]  ;;  %v112_v31 = vcombine.high %v104_v23, %v104_v23  ;;  %v111_v32 = vrot.slane %v97_v24, %v103_v10  ;;  %v504_v34 = vpack.c.bf16 %v61_v26, %v60_v22  ;;  %v30_v36 = vld [vmem:[%s779_s1 + $0x70] sm:$0xff]  ;;  %v80_v44 = vld [vmem:[%s779_s1 + $0x200] sm:$0xff] }
  0x16   :  { %467 = vmatprep.subr.bf16.mxu0 %v466_v6  ;;  %v31_v37 = vld [vmem:[%s779_s1 + $0x78] sm:$0xff]  ;;  %v506_v39 = vpack.c.bf16 %v79_v30, %v78_v29  ;;  %v62_v40 = vld [vmem:[%s779_s1 + $0x170] sm:$0xff]  ;;  %v81_v45 = vld [vmem:[%s779_s1 + $0x208] sm:$0xff] }
  0x17   :  { %497 = vmatpush3.bf16.msra.mxu1 %v496_v5  ;;  %v113_v38 = vcombine.high %v111_v32, %v111_v32  ;;  %192 = vmatprep.mubr.f32.mxu0 %v112_v31  ;;  %v63_v41 = vld [vmem:[%s779_s1 + $0x178] sm:$0xff]  ;;  %v476_v42 = vpack.c.bf16 %v31_v37, %v30_v36  ;;  %v511_v46 = vpack.c.bf16 %v81_v45, %v80_v44  ;;  %v82_v48 = vld [vmem:[%s779_s1 + $0x210] sm:$0xff]  ;;  %v84_v51 = vld [vmem:[%s779_s1 + $0x220] sm:$0xff] }
  0x18   :  { %499 = vmatprep.subr.bf16.mxu1 %v498_v11  ;;  %v508_v43 = vpack.c.bf16 %v63_v41, %v62_v40  ;;  %v83_v49 = vld [vmem:[%s779_s1 + $0x218] sm:$0xff]  ;;  %v85_v52 = vld [vmem:[%s779_s1 + $0x228] sm:$0xff]  ;;  %v86_v55 = vld [vmem:[%s779_s1 + $0x230] sm:$0xff] }
  0x19   :  { %469 = vmatpush3.bf16.msra.mxu0 %v468_v16  ;;  %262 = vmatprep.mubr.f32.mxu1 %v113_v38  ;;  %v514_v50 = vpack.c.bf16 %v83_v49, %v82_v48  ;;  %v517_v54 = vpack.c.bf16 %v85_v52, %v84_v51  ;;  %v87_v56 = vld [vmem:[%s779_s1 + $0x238] sm:$0xff]  ;;  %v346_v58 = vld.sshfl [vmem:[%s780_s0 + $0x8] sm:$0x3 pattern:$0x76325410] }
  0x1a   :  { %471 = vmatprep.subr.bf16.mxu0 %v470_v19  ;;  %v520_v57 = vpack.c.bf16 %v87_v56, %v86_v55  ;;  %v345_v60 = vld [vmem:[%s781_s2] ss:$0 sm:$0xff] }
  0x1b   :  { %501 = vmatpush3.bf16.msra.mxu1 %v500_v17 }
  0x1c   :  { %503 = vmatprep.subr.bf16.mxu1 %v502_v25 }
  0x1d   :  { %473 = vmatpush3.bf16.msra.mxu0 %v472_v33 }
  0x1e   :  { %475 = vmatprep.subr.bf16.mxu0 %v474_v35 }
  0x1f   :  { %505 = vmatpush3.bf16.msra.mxu1 %v504_v34 }
  0x20   :  { %507 = vmatprep.subr.bf16.mxu1 %v506_v39 }
  0x21   :  { %477 = vmatpush3.bf16.msra.mxu0 %v476_v42 }
  0x22   :  { %510 = vmatprep.subr.bf16.mxu0 %v528_v47 }
  0x23   :  { %509 = vmatpush3.bf16.msra.mxu1 %v508_v43 }
  0x24   :  { %193 = vmatmul.mubr.f32.vlgmr.msra.gmra.mrb[0].mxu0 %v104_v23 }
  0x25   :  { %512 = vmatpush3.bf16.msra.mxu0 %v511_v46  ;;  %443 = vmatprep.mubr.msk.f32.mxu0 %vm529_vm0, %v530_v53 }
  0x26   :  { %263 = vmatmul.mubr.f32.vlgmr.msra.gmra.mrb[0].mxu1 %v111_v32  ;;  %513 = vmatprep.subr.bf16.mxu0 %v528_v47 }
  0x29   :  { %515 = vmatpush3.bf16.msra.mxu0 %v514_v50 }
  0x2a   :  { %516 = vmatprep.subr.bf16.mxu0 %v528_v47 }
  0x2d   :  { %518 = vmatpush3.bf16.msra.mxu0 %v517_v54 }
  0x2e   :  { %519 = vmatprep.subr.bf16.mxu0 %v528_v47 }
  0x31   :  { %521 = vmatpush3.bf16.msra.mxu0 %v520_v57 }
  0x34   :  { %444 = vmatmul.mubr.msk.f32.vlgmr.msra.gmra.mrb[2].mxu0 %vm125_vm1, %v346_v58 }
  0xf7   :  { %v380_v59 = vpop.f32.mrb[0].mxu0 }
  0xf8   :  { %v381_v61 = vpop.f32.mrb[1].mxu0 }
  0xf9   :  { %v415_v62 = vpop.f32.mrb[0].mxu1  ;;  %v382_v63 = vadd.f32 %v381_v61, %v380_v59 }
  0xfa   :  { %v416_v0 = vpop.f32.mrb[1].mxu1 }
  0xfb   :  { %v417_v1 = vadd.f32 %v416_v0, %v415_v62  ;;  %v195_v2 = vadd.f32 %v382_v63, %v345_v60 }
  0xfd   :  { %v265_v3 = vadd.f32 %v417_v1, %v195_v2 }
 0x107   :  { %v334_v4 = vpop.f32.mrb[2].mxu0 }
 0x108   :  { %v335_v5 = vadd.f32 %v334_v4, %v265_v3  ;;  %v445_v6 = vpop.f32.mrb[3].mxu0 }
 0x10a   :  { %v338_v7 = vmax.f32 %v335_v5, 0.0 }
 0x10c   :  { %340 = vst.msk [vmem:[%s782_s3] sm:$0x3] %vm339_vm2, %v338_v7 }

</bundles_post_ra>
